<compile_context>
chip_gen: v7x
topology: tpu7x:2x2x1
jax: 0.10.0
libtpu: 0.0.40
codegen_flags: <defaults>
</compile_context>

<pallas_src>
import math

import jax
import jax.numpy as jnp
from jax import lax
from jax.experimental import pallas as pl
from jax.experimental.pallas import tpu as pltpu

# ---- small RoBERTa config (synthetic, deterministic init) ----
B, S, H = 2, 8, 32          # batch, max_seq_len, hidden_size
NH, DH = 4, 8               # num_attention_heads, head_dim (NH*DH == H)
I = 64                      # intermediate_size
VOCAB = 64                  # vocab_size
MAX_POS = 20                # max_position_embeddings
TYPE_VOCAB = 1              # token_type vocab (RoBERTa uses 1)
PAD_ID = 1                  # RoBERTa padding_idx
LN_EPS = 1e-5
N_LAYERS = 2
HP = 128                    # lane-dense padded output width (multiple of 128)


# ----------------- in-kernel helpers (f32 vector math) -----------------
def _layer_norm(x, gamma, beta):
    mu = jnp.mean(x, axis=-1, keepdims=True)
    var = jnp.mean((x - mu) ** 2, axis=-1, keepdims=True)
    return (x - mu) * lax.rsqrt(var + LN_EPS) * gamma + beta


def _gelu(x):
    # TODO(synk): HF RoBERTa uses the erf-based GELU; tanh approximation used here for
    # Mosaic-friendly lowering (numerically very close).
    c = math.sqrt(2.0 / math.pi)
    return 0.5 * x * (1.0 + jnp.tanh(c * (x + 0.044715 * x * x * x)))


# -------- fused Pallas kernel: embeddings-LN -> N encoder layers -> pooler --------
def fused_roberta_kernel(emb_ref, bias_ref,
                         embg_ref, embb_ref,
                         wqkv_ref, bqkv_ref, wo_ref, bo_ref, ln1g_ref, ln1b_ref,
                         w1_ref, b1_ref, w2_ref, b2_ref, ln2g_ref, ln2b_ref,
                         poolw_ref, poolb_ref,
                         seq_ref, pooled_ref):
    # Embedding LayerNorm.
    x = _layer_norm(emb_ref[0], embg_ref[...], embb_ref[...])           # (S, H) f32
    # Additive attention-mask bias, kept as a single (1, S) row (broadcast at the add).
    bias_row = bias_ref[0]                                              # (1, S) f32

    for l in range(N_LAYERS):  # static unrolled layer loop; x stays resident on-chip
        x16 = x.astype(jnp.bfloat16)

        # Fused QKV: ONE lane-dense (S,H)x(H,3H) MXU matmul; f32 accumulate, then bias add and
        # bf16 cast fused into a single elementwise pass.  (1/sqrt(DH) already folded into Q.)
        qkv16 = (jnp.dot(x16, wqkv_ref[l], preferred_element_type=jnp.float32)
                 + bqkv_ref[l]).astype(jnp.bfloat16)                    # (S, 3H) bf16

        # Per-head attention core (static unroll over NH): scores, masked softmax, context.
        ctx_heads = []
        for h in range(NH):
            lo = h * DH
            q_h = qkv16[:, lo:lo + DH]                                  # (S, DH) bf16
            k_h = qkv16[:, H + lo:H + lo + DH]                          # (S, DH) bf16
            v_h = qkv16[:, 2 * H + lo:2 * H + lo + DH]                  # (S, DH) bf16
            # Scores: contract DH on both operands (implicit K^T, no explicit transpose).
            s_h = lax.dot_general(q_h, k_h, (((1,), (1,)), ((), ())),
                                  preferred_element_type=jnp.float32) + bias_row   # (S, S)
            s_h = s_h - jnp.max(s_h, axis=-1, keepdims=True)
            p_h = jnp.exp(s_h)
            p_h = p_h * pl.reciprocal(jnp.sum(p_h, axis=-1, keepdims=True), approx=True)
            ctx_heads.append(jnp.dot(p_h.astype(jnp.bfloat16), v_h,
                                     preferred_element_type=jnp.float32))           # (S, DH)

        # Single lane-dense output projection on the concatenated head contexts
        # (replaces the head-batched matmul + head-sum).
        ctx = jnp.concatenate(ctx_heads, axis=-1).astype(jnp.bfloat16)               # (S, H)
        attn_out = jnp.dot(ctx, wo_ref[l],
                           preferred_element_type=jnp.float32) + bo_ref[l]           # (S, H)

        h1 = _layer_norm(x + attn_out, ln1g_ref[l], ln1b_ref[l])

        ff = _gelu(jnp.dot(h1.astype(jnp.bfloat16), w1_ref[l],
                           preferred_element_type=jnp.float32) + b1_ref[l])          # (S, I)
        ff_out = jnp.dot(ff.astype(jnp.bfloat16), w2_ref[l],
                         preferred_element_type=jnp.float32) + b2_ref[l]             # (S, H)
        x = _layer_norm(h1 + ff_out, ln2g_ref[l], ln2b_ref[l])

    # Lane-dense stores: zero-pad the H=32 feature dim to 128 lanes so the vst is unmasked;
    # the wrapper slices back to H (pure layout plumbing).
    seq_ref[0] = jnp.concatenate([x, jnp.zeros((S, HP - H), jnp.float32)], axis=-1)

    cls16 = x[0:1, :].astype(jnp.bfloat16)                              # (1, H) CLS token
    pooled_ref[0] = jnp.tanh(
        jnp.dot(cls16, poolw_ref[...], preferred_element_type=jnp.float32)
        + poolb_ref[...])                                               # (1, HP)


# ----------------- pallas_call wrapper -----------------
def _weight_spec(arr):
    nd = arr.ndim
    return pl.BlockSpec(arr.shape, lambda b, _nd=nd: (0,) * _nd)


def run_fused_roberta(emb, mask_bias, w):
    weight_args = [w["emb_ln_g"], w["emb_ln_b"],
                   w["wqkv"], w["bqkv"], w["wo"], w["bo"], w["ln1g"], w["ln1b"],
                   w["w1"], w["b1"], w["w2"], w["b2"], w["ln2g"], w["ln2b"],
                   w["pool_w"], w["pool_b"]]
    in_specs = [pl.BlockSpec((1, S, H), lambda b: (b, 0, 0)),
                pl.BlockSpec((1, 1, S), lambda b: (b, 0, 0))]
    in_specs += [_weight_spec(a) for a in weight_args]
    return pl.pallas_call(
        fused_roberta_kernel,
        out_shape=(jax.ShapeDtypeStruct((B, S, HP), jnp.float32),
                   jax.ShapeDtypeStruct((B, 1, HP), jnp.float32)),
        grid=(B,),
        in_specs=in_specs,
        out_specs=(pl.BlockSpec((1, S, HP), lambda b: (b, 0, 0)),
                   pl.BlockSpec((1, 1, HP), lambda b: (b, 0, 0))),
        compiler_params=pltpu.CompilerParams(
            dimension_semantics=("parallel",),          # 2 parallel blocks -> both v7x TCs busy
            vmem_limit_bytes=32 * 1024 * 1024),
    )(emb, mask_bias, *weight_args)


# ----------------- parameter init, layout prep & forward -----------------
def init_params(key):
    def dense(k, shape):
        return 0.02 * jax.random.normal(k, shape, dtype=jnp.float32)

    keys = jax.random.split(key, 8 + N_LAYERS)
    params = {
        "word_emb": dense(keys[0], (VOCAB, H)),
        "pos_emb": dense(keys[1], (MAX_POS, H)),
        "type_emb": dense(keys[2], (TYPE_VOCAB, H)),
        "emb_ln_g": jnp.ones((1, H), jnp.float32),
        "emb_ln_b": jnp.zeros((1, H), jnp.float32),
        "pool_w": dense(keys[3], (H, H)),
        "pool_b": jnp.zeros((1, H), jnp.float32),
        "layers": [],
    }
    for li in range(N_LAYERS):
        lk = jax.random.split(keys[8 + li], 8)
        params["layers"].append({
            "wq": dense(lk[0], (H, H)), "bq": jnp.zeros((1, H), jnp.float32),
            "wk": dense(lk[1], (H, H)), "bk": jnp.zeros((1, H), jnp.float32),
            "wv": dense(lk[2], (H, H)), "bv": jnp.zeros((1, H), jnp.float32),
            "wo": dense(lk[3], (H, H)), "bo": jnp.zeros((1, H), jnp.float32),
            "ln1g": jnp.ones((1, H), jnp.float32), "ln1b": jnp.zeros((1, H), jnp.float32),
            "w1": dense(lk[4], (H, I)), "b1": jnp.zeros((1, I), jnp.float32),
            "w2": dense(lk[5], (I, H)), "b2": jnp.zeros((1, H), jnp.float32),
            "ln2g": jnp.ones((1, H), jnp.float32), "ln2b": jnp.zeros((1, H), jnp.float32),
        })
    return params


def prepare_weights(params):
    """Pure layout/dtype transform of canonical params for the fused kernel:
    Q/K/V weights concatenated into one (L, H, 3H) bf16 matrix (1/sqrt(DH) folded into the
    Q columns and Q bias), output/FFN weights stacked per layer and cast to bf16 (MXU fast
    path), biases & LayerNorm params kept f32, pooler weights zero-padded to 128 output lanes
    so the pooled store is lane-dense."""
    scale = 1.0 / math.sqrt(DH)
    bf16 = jnp.bfloat16
    layers = params["layers"]
    stack = lambda name: jnp.stack([lp[name] for lp in layers])

    wqkv = jnp.stack([jnp.concatenate([lp["wq"] * scale, lp["wk"], lp["wv"]], axis=1)
                      for lp in layers]).astype(bf16)                   # (L, H, 3H)
    bqkv = jnp.stack([jnp.concatenate([lp["bq"] * scale, lp["bk"], lp["bv"]], axis=1)
                      for lp in layers])                                # (L, 1, 3H)
    pool_w = jnp.zeros((H, HP), jnp.float32).at[:, :H].set(params["pool_w"]).astype(bf16)
    pool_b = jnp.zeros((1, HP), jnp.float32).at[:, :H].set(params["pool_b"])

    return {
        "emb_ln_g": params["emb_ln_g"], "emb_ln_b": params["emb_ln_b"],
        "wqkv": wqkv, "bqkv": bqkv,
        "wo": stack("wo").astype(bf16), "bo": stack("bo"),
        "ln1g": stack("ln1g"), "ln1b": stack("ln1b"),
        "w1": stack("w1").astype(bf16), "b1": stack("b1"),
        "w2": stack("w2").astype(bf16), "b2": stack("b2"),
        "ln2g": stack("ln2g"), "ln2b": stack("ln2b"),
        "pool_w": pool_w, "pool_b": pool_b,
    }


@jax.jit
def roberta_forward(input_ids, segment_ids, padding_mask, params):
    # RoBERTa position ids: cumsum over non-pad positions, offset by padding_idx.
    not_pad = (input_ids != PAD_ID).astype(jnp.int32)
    position_ids = jnp.cumsum(not_pad, axis=1) * not_pad + PAD_ID

    # Embedding gathers (plain-JAX glue); everything downstream runs in one Pallas kernel.
    word = jnp.take(params["word_emb"], input_ids, axis=0)
    pos = jnp.take(params["pos_emb"], position_ids, axis=0)
    tok = jnp.take(params["type_emb"], segment_ids, axis=0)
    emb = word + pos + tok                                              # (B, S, H)

    # Extended attention mask: (1 - mask) * -10000, shape (B, 1, S).
    mask_bias = (1.0 - padding_mask.astype(jnp.float32))[:, None, :] * -10000.0

    seq_pad, pooled_pad = run_fused_roberta(emb, mask_bias, prepare_weights(params))
    # Slice away the lane padding (pure layout plumbing).
    return seq_pad[:, :, :H], pooled_pad[:, 0, :H]  # (sequence_output, pooled_output)


if __name__ == "__main__":
    key = jax.random.PRNGKey(0)
    k_param, k_ids = jax.random.split(key)
    params = init_params(k_param)

    # Deterministic inputs: token ids in [2, VOCAB), last 2 tokens of batch 1 are padding.
    input_ids = jax.random.randint(k_ids, (B, S), 2, VOCAB, dtype=jnp.int32)
    padding_mask = jnp.ones((B, S), jnp.int32)
    padding_mask = padding_mask.at[1, S - 2:].set(0)
    input_ids = jnp.where(padding_mask == 1, input_ids, PAD_ID)
    segment_ids = jnp.zeros((B, S), jnp.int32)

    seq_out, pooled_out = roberta_forward(input_ids, segment_ids, padding_mask, params)
    jax.block_until_ready((seq_out, pooled_out))
    assert seq_out.shape == (B, S, H) and pooled_out.shape == (B, H)
    print("KERNEL_OK")
</pallas_src>

<mosaic_0001>
module attributes {stable_mosaic.version = 11 : i64} {
  func.func @fused_roberta_kernel(%arg0: i32, %arg1: memref<1x8x32xf32, #tpu.memory_space<vmem>>, %arg2: memref<1x1x8xf32, #tpu.memory_space<vmem>>, %arg3: memref<1x32xf32, #tpu.memory_space<vmem>>, %arg4: memref<1x32xf32, #tpu.memory_space<vmem>>, %arg5: memref<2x32x96xbf16, #tpu.memory_space<vmem>>, %arg6: memref<2x1x96xf32, #tpu.memory_space<vmem>>, %arg7: memref<2x32x32xbf16, #tpu.memory_space<vmem>>, %arg8: memref<2x1x32xf32, #tpu.memory_space<vmem>>, %arg9: memref<2x1x32xf32, #tpu.memory_space<vmem>>, %arg10: memref<2x1x32xf32, #tpu.memory_space<vmem>>, %arg11: memref<2x32x64xbf16, #tpu.memory_space<vmem>>, %arg12: memref<2x1x64xf32, #tpu.memory_space<vmem>>, %arg13: memref<2x64x32xbf16, #tpu.memory_space<vmem>>, %arg14: memref<2x1x32xf32, #tpu.memory_space<vmem>>, %arg15: memref<2x1x32xf32, #tpu.memory_space<vmem>>, %arg16: memref<2x1x32xf32, #tpu.memory_space<vmem>>, %arg17: memref<32x128xbf16, #tpu.memory_space<vmem>>, %arg18: memref<1x128xf32, #tpu.memory_space<vmem>>, %arg19: memref<1x8x128xf32, #tpu.memory_space<vmem>>, %arg20: memref<1x1x128xf32, #tpu.memory_space<vmem>>) attributes {dimension_semantics = [#tpu.dimension_semantics<parallel>], iteration_bounds = array<i64: 2>, scalar_prefetch = 0 : i64, scratch_operands = 0 : i64, tpu.core_type = #tpu.core_type<tc>, window_params = [{transform_indices = @transform_0, window_bounds = array<i64: 1, 8, 32>}, {transform_indices = @transform_1, window_bounds = array<i64: 1, 1, 8>}, {pipeline_mode = #tpu.pipeline_mode<synchronous>, transform_indices = @transform_2, window_bounds = array<i64: 1, 32>}, {pipeline_mode = #tpu.pipeline_mode<synchronous>, transform_indices = @transform_3, window_bounds = array<i64: 1, 32>}, {pipeline_mode = #tpu.pipeline_mode<synchronous>, transform_indices = @transform_4, window_bounds = array<i64: 2, 32, 96>}, {pipeline_mode = #tpu.pipeline_mode<synchronous>, transform_indices = @transform_5, window_bounds = array<i64: 2, 1, 96>}, {pipeline_mode = #tpu.pipeline_mode<synchronous>, transform_indices = @transform_6, window_bounds = array<i64: 2, 32, 32>}, {pipeline_mode = #tpu.pipeline_mode<synchronous>, transform_indices = @transform_7, window_bounds = array<i64: 2, 1, 32>}, {pipeline_mode = #tpu.pipeline_mode<synchronous>, transform_indices = @transform_8, window_bounds = array<i64: 2, 1, 32>}, {pipeline_mode = #tpu.pipeline_mode<synchronous>, transform_indices = @transform_9, window_bounds = array<i64: 2, 1, 32>}, {pipeline_mode = #tpu.pipeline_mode<synchronous>, transform_indices = @transform_10, window_bounds = array<i64: 2, 32, 64>}, {pipeline_mode = #tpu.pipeline_mode<synchronous>, transform_indices = @transform_11, window_bounds = array<i64: 2, 1, 64>}, {pipeline_mode = #tpu.pipeline_mode<synchronous>, transform_indices = @transform_12, window_bounds = array<i64: 2, 64, 32>}, {pipeline_mode = #tpu.pipeline_mode<synchronous>, transform_indices = @transform_13, window_bounds = array<i64: 2, 1, 32>}, {pipeline_mode = #tpu.pipeline_mode<synchronous>, transform_indices = @transform_14, window_bounds = array<i64: 2, 1, 32>}, {pipeline_mode = #tpu.pipeline_mode<synchronous>, transform_indices = @transform_15, window_bounds = array<i64: 2, 1, 32>}, {pipeline_mode = #tpu.pipeline_mode<synchronous>, transform_indices = @transform_16, window_bounds = array<i64: 32, 128>}, {pipeline_mode = #tpu.pipeline_mode<synchronous>, transform_indices = @transform_17, window_bounds = array<i64: 1, 128>}, {transform_indices = @transform_18, window_bounds = array<i64: 1, 8, 128>}, {transform_indices = @transform_19, window_bounds = array<i64: 1, 1, 128>}]} {
    %c0 = arith.constant 0 : index
    %c0_0 = arith.constant 0 : index
    %c0_1 = arith.constant 0 : index
    %0 = vector.load %arg1[%c0, %c0_0, %c0_1] : memref<1x8x32xf32, #tpu.memory_space<vmem>>, vector<1x8x32xf32>
    %1 = vector.shape_cast %0 : vector<1x8x32xf32> to vector<8x32xf32>
    %c0_2 = arith.constant 0 : index
    %c0_3 = arith.constant 0 : index
    %2 = vector.load %arg3[%c0_2, %c0_3] : memref<1x32xf32, #tpu.memory_space<vmem>>, vector<1x32xf32>
    %c0_4 = arith.constant 0 : index
    %c0_5 = arith.constant 0 : index
    %3 = vector.load %arg4[%c0_4, %c0_5] : memref<1x32xf32, #tpu.memory_space<vmem>>, vector<1x32xf32>
    %cst = arith.constant dense<0.000000e+00> : vector<8xf32>
    %4 = vector.multi_reduction <add>, %1, %cst [1] : vector<8x32xf32> to vector<8xf32>
    %5 = vector.shape_cast %4 : vector<8xf32> to vector<8x1xf32>
    %cst_6 = arith.constant 3.200000e+01 : f32
    %6 = vector.broadcast %cst_6 : f32 to vector<8x1xf32>
    %7 = arith.divf %5, %6 : vector<8x1xf32>
    %8 = vector.broadcast %7 : vector<8x1xf32> to vector<8x32xf32>
    %9 = arith.subf %1, %8 : vector<8x32xf32>
    %10 = arith.mulf %9, %9 : vector<8x32xf32>
    %cst_7 = arith.constant dense<0.000000e+00> : vector<8xf32>
    %11 = vector.multi_reduction <add>, %10, %cst_7 [1] : vector<8x32xf32> to vector<8xf32>
    %12 = vector.shape_cast %11 : vector<8xf32> to vector<8x1xf32>
    %cst_8 = arith.constant 3.200000e+01 : f32
    %13 = vector.broadcast %cst_8 : f32 to vector<8x1xf32>
    %14 = arith.divf %12, %13 : vector<8x1xf32>
    %15 = vector.broadcast %7 : vector<8x1xf32> to vector<8x32xf32>
    %16 = arith.subf %1, %15 : vector<8x32xf32>
    %cst_9 = arith.constant 9.99999974E-6 : f32
    %17 = vector.broadcast %cst_9 : f32 to vector<8x1xf32>
    %18 = arith.addf %14, %17 : vector<8x1xf32>
    %19 = math.rsqrt %18 : vector<8x1xf32>
    %20 = vector.broadcast %19 : vector<8x1xf32> to vector<8x32xf32>
    %21 = arith.mulf %16, %20 : vector<8x32xf32>
    %22 = vector.broadcast %2 : vector<1x32xf32> to vector<8x32xf32>
    %23 = arith.mulf %21, %22 : vector<8x32xf32>
    %24 = vector.broadcast %3 : vector<1x32xf32> to vector<8x32xf32>
    %25 = arith.addf %23, %24 : vector<8x32xf32>
    %c0_10 = arith.constant 0 : index
    %c0_11 = arith.constant 0 : index
    %c0_12 = arith.constant 0 : index
    %26 = vector.load %arg2[%c0_10, %c0_11, %c0_12] : memref<1x1x8xf32, #tpu.memory_space<vmem>>, vector<1x1x8xf32>
    %27 = vector.shape_cast %26 : vector<1x1x8xf32> to vector<1x8xf32>
    %28 = arith.truncf %25 : vector<8x32xf32> to vector<8x32xbf16>
    %c0_13 = arith.constant 0 : index
    %c0_14 = arith.constant 0 : index
    %c0_15 = arith.constant 0 : index
    %29 = vector.load %arg5[%c0_13, %c0_14, %c0_15] : memref<2x32x96xbf16, #tpu.memory_space<vmem>>, vector<1x32x96xbf16>
    %30 = vector.shape_cast %29 : vector<1x32x96xbf16> to vector<32x96xbf16>
    %cst_16 = arith.constant dense<0.000000e+00> : vector<8x96xf32>
    %31 = tpu.matmul %28, %30, %cst_16 {dimension_numbers = #tpu.dot_dimension_numbers<[1], [0], [0], [1], [0, 0, 1, 1], [], []>} : vector<8x32xbf16>, vector<32x96xbf16>, vector<8x96xf32> -> vector<8x96xf32>
    %c0_17 = arith.constant 0 : index
    %c0_18 = arith.constant 0 : index
    %c0_19 = arith.constant 0 : index
    %32 = vector.load %arg6[%c0_17, %c0_18, %c0_19] : memref<2x1x96xf32, #tpu.memory_space<vmem>>, vector<1x1x96xf32>
    %33 = vector.shape_cast %32 : vector<1x1x96xf32> to vector<1x96xf32>
    %34 = vector.broadcast %33 : vector<1x96xf32> to vector<8x96xf32>
    %35 = arith.addf %31, %34 : vector<8x96xf32>
    %36 = arith.truncf %35 : vector<8x96xf32> to vector<8x96xbf16>
    %37 = vector.extract_strided_slice %36 {offsets = [0, 0], sizes = [8, 8], strides = [1, 1]} : vector<8x96xbf16> to vector<8x8xbf16>
    %38 = vector.extract_strided_slice %36 {offsets = [0, 32], sizes = [8, 8], strides = [1, 1]} : vector<8x96xbf16> to vector<8x8xbf16>
    %39 = vector.extract_strided_slice %36 {offsets = [0, 64], sizes = [8, 8], strides = [1, 1]} : vector<8x96xbf16> to vector<8x8xbf16>
    %cst_20 = arith.constant dense<0.000000e+00> : vector<8x8xf32>
    %40 = tpu.matmul %37, %38, %cst_20 {dimension_numbers = #tpu.dot_dimension_numbers<[1], [1], [0], [0], [0, 0, 1, 0], [], []>} : vector<8x8xbf16>, vector<8x8xbf16>, vector<8x8xf32> -> vector<8x8xf32>
    %41 = vector.broadcast %27 : vector<1x8xf32> to vector<8x8xf32>
    %42 = arith.addf %40, %41 : vector<8x8xf32>
    %cst_21 = arith.constant dense<0xFF800000> : vector<8xf32>
    %43 = vector.multi_reduction <maximumf>, %42, %cst_21 [1] : vector<8x8xf32> to vector<8xf32>
    %44 = vector.shape_cast %43 : vector<8xf32> to vector<8x1xf32>
    %45 = vector.broadcast %44 : vector<8x1xf32> to vector<8x8xf32>
    %46 = arith.subf %42, %45 : vector<8x8xf32>
    %47 = math.exp %46 : vector<8x8xf32>
    %cst_22 = arith.constant dense<0.000000e+00> : vector<8xf32>
    %48 = vector.multi_reduction <add>, %47, %cst_22 [1] : vector<8x8xf32> to vector<8xf32>
    %49 = vector.shape_cast %48 : vector<8xf32> to vector<8x1xf32>
    %50 = tpu.reciprocal %49 {approx = true} : vector<8x1xf32> -> vector<8x1xf32>
    %51 = vector.broadcast %50 : vector<8x1xf32> to vector<8x8xf32>
    %52 = arith.mulf %47, %51 : vector<8x8xf32>
    %53 = arith.truncf %52 : vector<8x8xf32> to vector<8x8xbf16>
    %cst_23 = arith.constant dense<0.000000e+00> : vector<8x8xf32>
    %54 = tpu.matmul %53, %39, %cst_23 {dimension_numbers = #tpu.dot_dimension_numbers<[1], [0], [0], [1], [0, 0, 1, 1], [], []>} : vector<8x8xbf16>, vector<8x8xbf16>, vector<8x8xf32> -> vector<8x8xf32>
    %55 = vector.extract_strided_slice %36 {offsets = [0, 8], sizes = [8, 8], strides = [1, 1]} : vector<8x96xbf16> to vector<8x8xbf16>
    %56 = vector.extract_strided_slice %36 {offsets = [0, 40], sizes = [8, 8], strides = [1, 1]} : vector<8x96xbf16> to vector<8x8xbf16>
    %57 = vector.extract_strided_slice %36 {offsets = [0, 72], sizes = [8, 8], strides = [1, 1]} : vector<8x96xbf16> to vector<8x8xbf16>
    %cst_24 = arith.constant dense<0.000000e+00> : vector<8x8xf32>
    %58 = tpu.matmul %55, %56, %cst_24 {dimension_numbers = #tpu.dot_dimension_numbers<[1], [1], [0], [0], [0, 0, 1, 0], [], []>} : vector<8x8xbf16>, vector<8x8xbf16>, vector<8x8xf32> -> vector<8x8xf32>
    %59 = vector.broadcast %27 : vector<1x8xf32> to vector<8x8xf32>
    %60 = arith.addf %58, %59 : vector<8x8xf32>
    %cst_25 = arith.constant dense<0xFF800000> : vector<8xf32>
    %61 = vector.multi_reduction <maximumf>, %60, %cst_25 [1] : vector<8x8xf32> to vector<8xf32>
    %62 = vector.shape_cast %61 : vector<8xf32> to vector<8x1xf32>
    %63 = vector.broadcast %62 : vector<8x1xf32> to vector<8x8xf32>
    %64 = arith.subf %60, %63 : vector<8x8xf32>
    %65 = math.exp %64 : vector<8x8xf32>
    %cst_26 = arith.constant dense<0.000000e+00> : vector<8xf32>
    %66 = vector.multi_reduction <add>, %65, %cst_26 [1] : vector<8x8xf32> to vector<8xf32>
    %67 = vector.shape_cast %66 : vector<8xf32> to vector<8x1xf32>
    %68 = tpu.reciprocal %67 {approx = true} : vector<8x1xf32> -> vector<8x1xf32>
    %69 = vector.broadcast %68 : vector<8x1xf32> to vector<8x8xf32>
    %70 = arith.mulf %65, %69 : vector<8x8xf32>
    %71 = arith.truncf %70 : vector<8x8xf32> to vector<8x8xbf16>
    %cst_27 = arith.constant dense<0.000000e+00> : vector<8x8xf32>
    %72 = tpu.matmul %71, %57, %cst_27 {dimension_numbers = #tpu.dot_dimension_numbers<[1], [0], [0], [1], [0, 0, 1, 1], [], []>} : vector<8x8xbf16>, vector<8x8xbf16>, vector<8x8xf32> -> vector<8x8xf32>
    %73 = vector.extract_strided_slice %36 {offsets = [0, 16], sizes = [8, 8], strides = [1, 1]} : vector<8x96xbf16> to vector<8x8xbf16>
    %74 = vector.extract_strided_slice %36 {offsets = [0, 48], sizes = [8, 8], strides = [1, 1]} : vector<8x96xbf16> to vector<8x8xbf16>
    %75 = vector.extract_strided_slice %36 {offsets = [0, 80], sizes = [8, 8], strides = [1, 1]} : vector<8x96xbf16> to vector<8x8xbf16>
    %cst_28 = arith.constant dense<0.000000e+00> : vector<8x8xf32>
    %76 = tpu.matmul %73, %74, %cst_28 {dimension_numbers = #tpu.dot_dimension_numbers<[1], [1], [0], [0], [0, 0, 1, 0], [], []>} : vector<8x8xbf16>, vector<8x8xbf16>, vector<8x8xf32> -> vector<8x8xf32>
    %77 = vector.broadcast %27 : vector<1x8xf32> to vector<8x8xf32>
    %78 = arith.addf %76, %77 : vector<8x8xf32>
    %cst_29 = arith.constant dense<0xFF800000> : vector<8xf32>
    %79 = vector.multi_reduction <maximumf>, %78, %cst_29 [1] : vector<8x8xf32> to vector<8xf32>
    %80 = vector.shape_cast %79 : vector<8xf32> to vector<8x1xf32>
    %81 = vector.broadcast %80 : vector<8x1xf32> to vector<8x8xf32>
    %82 = arith.subf %78, %81 : vector<8x8xf32>
    %83 = math.exp %82 : vector<8x8xf32>
    %cst_30 = arith.constant dense<0.000000e+00> : vector<8xf32>
    %84 = vector.multi_reduction <add>, %83, %cst_30 [1] : vector<8x8xf32> to vector<8xf32>
    %85 = vector.shape_cast %84 : vector<8xf32> to vector<8x1xf32>
    %86 = tpu.reciprocal %85 {approx = true} : vector<8x1xf32> -> vector<8x1xf32>
    %87 = vector.broadcast %86 : vector<8x1xf32> to vector<8x8xf32>
    %88 = arith.mulf %83, %87 : vector<8x8xf32>
    %89 = arith.truncf %88 : vector<8x8xf32> to vector<8x8xbf16>
    %cst_31 = arith.constant dense<0.000000e+00> : vector<8x8xf32>
    %90 = tpu.matmul %89, %75, %cst_31 {dimension_numbers = #tpu.dot_dimension_numbers<[1], [0], [0], [1], [0, 0, 1, 1], [], []>} : vector<8x8xbf16>, vector<8x8xbf16>, vector<8x8xf32> -> vector<8x8xf32>
    %91 = vector.extract_strided_slice %36 {offsets = [0, 24], sizes = [8, 8], strides = [1, 1]} : vector<8x96xbf16> to vector<8x8xbf16>
    %92 = vector.extract_strided_slice %36 {offsets = [0, 56], sizes = [8, 8], strides = [1, 1]} : vector<8x96xbf16> to vector<8x8xbf16>
    %93 = vector.extract_strided_slice %36 {offsets = [0, 88], sizes = [8, 8], strides = [1, 1]} : vector<8x96xbf16> to vector<8x8xbf16>
    %cst_32 = arith.constant dense<0.000000e+00> : vector<8x8xf32>
    %94 = tpu.matmul %91, %92, %cst_32 {dimension_numbers = #tpu.dot_dimension_numbers<[1], [1], [0], [0], [0, 0, 1, 0], [], []>} : vector<8x8xbf16>, vector<8x8xbf16>, vector<8x8xf32> -> vector<8x8xf32>
    %95 = vector.broadcast %27 : vector<1x8xf32> to vector<8x8xf32>
    %96 = arith.addf %94, %95 : vector<8x8xf32>
    %cst_33 = arith.constant dense<0xFF800000> : vector<8xf32>
    %97 = vector.multi_reduction <maximumf>, %96, %cst_33 [1] : vector<8x8xf32> to vector<8xf32>
    %98 = vector.shape_cast %97 : vector<8xf32> to vector<8x1xf32>
    %99 = vector.broadcast %98 : vector<8x1xf32> to vector<8x8xf32>
    %100 = arith.subf %96, %99 : vector<8x8xf32>
    %101 = math.exp %100 : vector<8x8xf32>
    %cst_34 = arith.constant dense<0.000000e+00> : vector<8xf32>
    %102 = vector.multi_reduction <add>, %101, %cst_34 [1] : vector<8x8xf32> to vector<8xf32>
    %103 = vector.shape_cast %102 : vector<8xf32> to vector<8x1xf32>
    %104 = tpu.reciprocal %103 {approx = true} : vector<8x1xf32> -> vector<8x1xf32>
    %105 = vector.broadcast %104 : vector<8x1xf32> to vector<8x8xf32>
    %106 = arith.mulf %101, %105 : vector<8x8xf32>
    %107 = arith.truncf %106 : vector<8x8xf32> to vector<8x8xbf16>
    %cst_35 = arith.constant dense<0.000000e+00> : vector<8x8xf32>
    %108 = tpu.matmul %107, %93, %cst_35 {dimension_numbers = #tpu.dot_dimension_numbers<[1], [0], [0], [1], [0, 0, 1, 1], [], []>} : vector<8x8xbf16>, vector<8x8xbf16>, vector<8x8xf32> -> vector<8x8xf32>
    %109 = tpu.concatenate %54, %72, %90, %108 in 1 : vector<8x8xf32>, vector<8x8xf32>, vector<8x8xf32>, vector<8x8xf32> -> vector<8x32xf32>
    %110 = arith.truncf %109 : vector<8x32xf32> to vector<8x32xbf16>
    %c0_36 = arith.constant 0 : index
    %c0_37 = arith.constant 0 : index
    %c0_38 = arith.constant 0 : index
    %111 = vector.load %arg7[%c0_36, %c0_37, %c0_38] : memref<2x32x32xbf16, #tpu.memory_space<vmem>>, vector<1x32x32xbf16>
    %112 = vector.shape_cast %111 : vector<1x32x32xbf16> to vector<32x32xbf16>
    %cst_39 = arith.constant dense<0.000000e+00> : vector<8x32xf32>
    %113 = tpu.matmul %110, %112, %cst_39 {dimension_numbers = #tpu.dot_dimension_numbers<[1], [0], [0], [1], [0, 0, 1, 1], [], []>} : vector<8x32xbf16>, vector<32x32xbf16>, vector<8x32xf32> -> vector<8x32xf32>
    %c0_40 = arith.constant 0 : index
    %c0_41 = arith.constant 0 : index
    %c0_42 = arith.constant 0 : index
    %114 = vector.load %arg8[%c0_40, %c0_41, %c0_42] : memref<2x1x32xf32, #tpu.memory_space<vmem>>, vector<1x1x32xf32>
    %115 = vector.shape_cast %114 : vector<1x1x32xf32> to vector<1x32xf32>
    %116 = vector.broadcast %115 : vector<1x32xf32> to vector<8x32xf32>
    %117 = arith.addf %113, %116 : vector<8x32xf32>
    %118 = arith.addf %25, %117 : vector<8x32xf32>
    %c0_43 = arith.constant 0 : index
    %c0_44 = arith.constant 0 : index
    %c0_45 = arith.constant 0 : index
    %119 = vector.load %arg9[%c0_43, %c0_44, %c0_45] : memref<2x1x32xf32, #tpu.memory_space<vmem>>, vector<1x1x32xf32>
    %120 = vector.shape_cast %119 : vector<1x1x32xf32> to vector<1x32xf32>
    %c0_46 = arith.constant 0 : index
    %c0_47 = arith.constant 0 : index
    %c0_48 = arith.constant 0 : index
    %121 = vector.load %arg10[%c0_46, %c0_47, %c0_48] : memref<2x1x32xf32, #tpu.memory_space<vmem>>, vector<1x1x32xf32>
    %122 = vector.shape_cast %121 : vector<1x1x32xf32> to vector<1x32xf32>
    %cst_49 = arith.constant dense<0.000000e+00> : vector<8xf32>
    %123 = vector.multi_reduction <add>, %118, %cst_49 [1] : vector<8x32xf32> to vector<8xf32>
    %124 = vector.shape_cast %123 : vector<8xf32> to vector<8x1xf32>
    %cst_50 = arith.constant 3.200000e+01 : f32
    %125 = vector.broadcast %cst_50 : f32 to vector<8x1xf32>
    %126 = arith.divf %124, %125 : vector<8x1xf32>
    %127 = vector.broadcast %126 : vector<8x1xf32> to vector<8x32xf32>
    %128 = arith.subf %118, %127 : vector<8x32xf32>
    %129 = arith.mulf %128, %128 : vector<8x32xf32>
    %cst_51 = arith.constant dense<0.000000e+00> : vector<8xf32>
    %130 = vector.multi_reduction <add>, %129, %cst_51 [1] : vector<8x32xf32> to vector<8xf32>
    %131 = vector.shape_cast %130 : vector<8xf32> to vector<8x1xf32>
    %cst_52 = arith.constant 3.200000e+01 : f32
    %132 = vector.broadcast %cst_52 : f32 to vector<8x1xf32>
    %133 = arith.divf %131, %132 : vector<8x1xf32>
    %134 = vector.broadcast %126 : vector<8x1xf32> to vector<8x32xf32>
    %135 = arith.subf %118, %134 : vector<8x32xf32>
    %cst_53 = arith.constant 9.99999974E-6 : f32
    %136 = vector.broadcast %cst_53 : f32 to vector<8x1xf32>
    %137 = arith.addf %133, %136 : vector<8x1xf32>
    %138 = math.rsqrt %137 : vector<8x1xf32>
    %139 = vector.broadcast %138 : vector<8x1xf32> to vector<8x32xf32>
    %140 = arith.mulf %135, %139 : vector<8x32xf32>
    %141 = vector.broadcast %120 : vector<1x32xf32> to vector<8x32xf32>
    %142 = arith.mulf %140, %141 : vector<8x32xf32>
    %143 = vector.broadcast %122 : vector<1x32xf32> to vector<8x32xf32>
    %144 = arith.addf %142, %143 : vector<8x32xf32>
    %145 = arith.truncf %144 : vector<8x32xf32> to vector<8x32xbf16>
    %c0_54 = arith.constant 0 : index
    %c0_55 = arith.constant 0 : index
    %c0_56 = arith.constant 0 : index
    %146 = vector.load %arg11[%c0_54, %c0_55, %c0_56] : memref<2x32x64xbf16, #tpu.memory_space<vmem>>, vector<1x32x64xbf16>
    %147 = vector.shape_cast %146 : vector<1x32x64xbf16> to vector<32x64xbf16>
    %cst_57 = arith.constant dense<0.000000e+00> : vector<8x64xf32>
    %148 = tpu.matmul %145, %147, %cst_57 {dimension_numbers = #tpu.dot_dimension_numbers<[1], [0], [0], [1], [0, 0, 1, 1], [], []>} : vector<8x32xbf16>, vector<32x64xbf16>, vector<8x64xf32> -> vector<8x64xf32>
    %c0_58 = arith.constant 0 : index
    %c0_59 = arith.constant 0 : index
    %c0_60 = arith.constant 0 : index
    %149 = vector.load %arg12[%c0_58, %c0_59, %c0_60] : memref<2x1x64xf32, #tpu.memory_space<vmem>>, vector<1x1x64xf32>
    %150 = vector.shape_cast %149 : vector<1x1x64xf32> to vector<1x64xf32>
    %151 = vector.broadcast %150 : vector<1x64xf32> to vector<8x64xf32>
    %152 = arith.addf %148, %151 : vector<8x64xf32>
    %cst_61 = arith.constant 5.000000e-01 : f32
    %153 = vector.broadcast %cst_61 : f32 to vector<8x64xf32>
    %154 = arith.mulf %153, %152 : vector<8x64xf32>
    %cst_62 = arith.constant 4.471500e-02 : f32
    %155 = vector.broadcast %cst_62 : f32 to vector<8x64xf32>
    %156 = arith.mulf %155, %152 : vector<8x64xf32>
    %157 = arith.mulf %156, %152 : vector<8x64xf32>
    %158 = arith.mulf %157, %152 : vector<8x64xf32>
    %159 = arith.addf %152, %158 : vector<8x64xf32>
    %cst_63 = arith.constant 0.797884583 : f32
    %160 = vector.broadcast %cst_63 : f32 to vector<8x64xf32>
    %161 = arith.mulf %160, %159 : vector<8x64xf32>
    %162 = math.tanh %161 : vector<8x64xf32>
    %cst_64 = arith.constant 1.000000e+00 : f32
    %163 = vector.broadcast %cst_64 : f32 to vector<8x64xf32>
    %164 = arith.addf %163, %162 : vector<8x64xf32>
    %165 = arith.mulf %154, %164 : vector<8x64xf32>
    %166 = arith.truncf %165 : vector<8x64xf32> to vector<8x64xbf16>
    %c0_65 = arith.constant 0 : index
    %c0_66 = arith.constant 0 : index
    %c0_67 = arith.constant 0 : index
    %167 = vector.load %arg13[%c0_65, %c0_66, %c0_67] : memref<2x64x32xbf16, #tpu.memory_space<vmem>>, vector<1x64x32xbf16>
    %168 = vector.shape_cast %167 : vector<1x64x32xbf16> to vector<64x32xbf16>
    %cst_68 = arith.constant dense<0.000000e+00> : vector<8x32xf32>
    %169 = tpu.matmul %166, %168, %cst_68 {dimension_numbers = #tpu.dot_dimension_numbers<[1], [0], [0], [1], [0, 0, 1, 1], [], []>} : vector<8x64xbf16>, vector<64x32xbf16>, vector<8x32xf32> -> vector<8x32xf32>
    %c0_69 = arith.constant 0 : index
    %c0_70 = arith.constant 0 : index
    %c0_71 = arith.constant 0 : index
    %170 = vector.load %arg14[%c0_69, %c0_70, %c0_71] : memref<2x1x32xf32, #tpu.memory_space<vmem>>, vector<1x1x32xf32>
    %171 = vector.shape_cast %170 : vector<1x1x32xf32> to vector<1x32xf32>
    %172 = vector.broadcast %171 : vector<1x32xf32> to vector<8x32xf32>
    %173 = arith.addf %169, %172 : vector<8x32xf32>
    %174 = arith.addf %144, %173 : vector<8x32xf32>
    %c0_72 = arith.constant 0 : index
    %c0_73 = arith.constant 0 : index
    %c0_74 = arith.constant 0 : index
    %175 = vector.load %arg15[%c0_72, %c0_73, %c0_74] : memref<2x1x32xf32, #tpu.memory_space<vmem>>, vector<1x1x32xf32>
    %176 = vector.shape_cast %175 : vector<1x1x32xf32> to vector<1x32xf32>
    %c0_75 = arith.constant 0 : index
    %c0_76 = arith.constant 0 : index
    %c0_77 = arith.constant 0 : index
    %177 = vector.load %arg16[%c0_75, %c0_76, %c0_77] : memref<2x1x32xf32, #tpu.memory_space<vmem>>, vector<1x1x32xf32>
    %178 = vector.shape_cast %177 : vector<1x1x32xf32> to vector<1x32xf32>
    %cst_78 = arith.constant dense<0.000000e+00> : vector<8xf32>
    %179 = vector.multi_reduction <add>, %174, %cst_78 [1] : vector<8x32xf32> to vector<8xf32>
    %180 = vector.shape_cast %179 : vector<8xf32> to vector<8x1xf32>
    %cst_79 = arith.constant 3.200000e+01 : f32
    %181 = vector.broadcast %cst_79 : f32 to vector<8x1xf32>
    %182 = arith.divf %180, %181 : vector<8x1xf32>
    %183 = vector.broadcast %182 : vector<8x1xf32> to vector<8x32xf32>
    %184 = arith.subf %174, %183 : vector<8x32xf32>
    %185 = arith.mulf %184, %184 : vector<8x32xf32>
    %cst_80 = arith.constant dense<0.000000e+00> : vector<8xf32>
    %186 = vector.multi_reduction <add>, %185, %cst_80 [1] : vector<8x32xf32> to vector<8xf32>
    %187 = vector.shape_cast %186 : vector<8xf32> to vector<8x1xf32>
    %cst_81 = arith.constant 3.200000e+01 : f32
    %188 = vector.broadcast %cst_81 : f32 to vector<8x1xf32>
    %189 = arith.divf %187, %188 : vector<8x1xf32>
    %190 = vector.broadcast %182 : vector<8x1xf32> to vector<8x32xf32>
    %191 = arith.subf %174, %190 : vector<8x32xf32>
    %cst_82 = arith.constant 9.99999974E-6 : f32
    %192 = vector.broadcast %cst_82 : f32 to vector<8x1xf32>
    %193 = arith.addf %189, %192 : vector<8x1xf32>
    %194 = math.rsqrt %193 : vector<8x1xf32>
    %195 = vector.broadcast %194 : vector<8x1xf32> to vector<8x32xf32>
    %196 = arith.mulf %191, %195 : vector<8x32xf32>
    %197 = vector.broadcast %176 : vector<1x32xf32> to vector<8x32xf32>
    %198 = arith.mulf %196, %197 : vector<8x32xf32>
    %199 = vector.broadcast %178 : vector<1x32xf32> to vector<8x32xf32>
    %200 = arith.addf %198, %199 : vector<8x32xf32>
    %201 = arith.truncf %200 : vector<8x32xf32> to vector<8x32xbf16>
    %c1 = arith.constant 1 : index
    %c0_83 = arith.constant 0 : index
    %c0_84 = arith.constant 0 : index
    %202 = vector.load %arg5[%c1, %c0_83, %c0_84] : memref<2x32x96xbf16, #tpu.memory_space<vmem>>, vector<1x32x96xbf16>
    %203 = vector.shape_cast %202 : vector<1x32x96xbf16> to vector<32x96xbf16>
    %cst_85 = arith.constant dense<0.000000e+00> : vector<8x96xf32>
    %204 = tpu.matmul %201, %203, %cst_85 {dimension_numbers = #tpu.dot_dimension_numbers<[1], [0], [0], [1], [0, 0, 1, 1], [], []>} : vector<8x32xbf16>, vector<32x96xbf16>, vector<8x96xf32> -> vector<8x96xf32>
    %c1_86 = arith.constant 1 : index
    %c0_87 = arith.constant 0 : index
    %c0_88 = arith.constant 0 : index
    %205 = vector.load %arg6[%c1_86, %c0_87, %c0_88] : memref<2x1x96xf32, #tpu.memory_space<vmem>>, vector<1x1x96xf32>
    %206 = vector.shape_cast %205 : vector<1x1x96xf32> to vector<1x96xf32>
    %207 = vector.broadcast %206 : vector<1x96xf32> to vector<8x96xf32>
    %208 = arith.addf %204, %207 : vector<8x96xf32>
    %209 = arith.truncf %208 : vector<8x96xf32> to vector<8x96xbf16>
    %210 = vector.extract_strided_slice %209 {offsets = [0, 0], sizes = [8, 8], strides = [1, 1]} : vector<8x96xbf16> to vector<8x8xbf16>
    %211 = vector.extract_strided_slice %209 {offsets = [0, 32], sizes = [8, 8], strides = [1, 1]} : vector<8x96xbf16> to vector<8x8xbf16>
    %212 = vector.extract_strided_slice %209 {offsets = [0, 64], sizes = [8, 8], strides = [1, 1]} : vector<8x96xbf16> to vector<8x8xbf16>
    %cst_89 = arith.constant dense<0.000000e+00> : vector<8x8xf32>
    %213 = tpu.matmul %210, %211, %cst_89 {dimension_numbers = #tpu.dot_dimension_numbers<[1], [1], [0], [0], [0, 0, 1, 0], [], []>} : vector<8x8xbf16>, vector<8x8xbf16>, vector<8x8xf32> -> vector<8x8xf32>
    %214 = vector.broadcast %27 : vector<1x8xf32> to vector<8x8xf32>
    %215 = arith.addf %213, %214 : vector<8x8xf32>
    %cst_90 = arith.constant dense<0xFF800000> : vector<8xf32>
    %216 = vector.multi_reduction <maximumf>, %215, %cst_90 [1] : vector<8x8xf32> to vector<8xf32>
    %217 = vector.shape_cast %216 : vector<8xf32> to vector<8x1xf32>
    %218 = vector.broadcast %217 : vector<8x1xf32> to vector<8x8xf32>
    %219 = arith.subf %215, %218 : vector<8x8xf32>
    %220 = math.exp %219 : vector<8x8xf32>
    %cst_91 = arith.constant dense<0.000000e+00> : vector<8xf32>
    %221 = vector.multi_reduction <add>, %220, %cst_91 [1] : vector<8x8xf32> to vector<8xf32>
    %222 = vector.shape_cast %221 : vector<8xf32> to vector<8x1xf32>
    %223 = tpu.reciprocal %222 {approx = true} : vector<8x1xf32> -> vector<8x1xf32>
    %224 = vector.broadcast %223 : vector<8x1xf32> to vector<8x8xf32>
    %225 = arith.mulf %220, %224 : vector<8x8xf32>
    %226 = arith.truncf %225 : vector<8x8xf32> to vector<8x8xbf16>
    %cst_92 = arith.constant dense<0.000000e+00> : vector<8x8xf32>
    %227 = tpu.matmul %226, %212, %cst_92 {dimension_numbers = #tpu.dot_dimension_numbers<[1], [0], [0], [1], [0, 0, 1, 1], [], []>} : vector<8x8xbf16>, vector<8x8xbf16>, vector<8x8xf32> -> vector<8x8xf32>
    %228 = vector.extract_strided_slice %209 {offsets = [0, 8], sizes = [8, 8], strides = [1, 1]} : vector<8x96xbf16> to vector<8x8xbf16>
    %229 = vector.extract_strided_slice %209 {offsets = [0, 40], sizes = [8, 8], strides = [1, 1]} : vector<8x96xbf16> to vector<8x8xbf16>
    %230 = vector.extract_strided_slice %209 {offsets = [0, 72], sizes = [8, 8], strides = [1, 1]} : vector<8x96xbf16> to vector<8x8xbf16>
    %cst_93 = arith.constant dense<0.000000e+00> : vector<8x8xf32>
    %231 = tpu.matmul %228, %229, %cst_93 {dimension_numbers = #tpu.dot_dimension_numbers<[1], [1], [0], [0], [0, 0, 1, 0], [], []>} : vector<8x8xbf16>, vector<8x8xbf16>, vector<8x8xf32> -> vector<8x8xf32>
    %232 = vector.broadcast %27 : vector<1x8xf32> to vector<8x8xf32>
    %233 = arith.addf %231, %232 : vector<8x8xf32>
    %cst_94 = arith.constant dense<0xFF800000> : vector<8xf32>
    %234 = vector.multi_reduction <maximumf>, %233, %cst_94 [1] : vector<8x8xf32> to vector<8xf32>
    %235 = vector.shape_cast %234 : vector<8xf32> to vector<8x1xf32>
    %236 = vector.broadcast %235 : vector<8x1xf32> to vector<8x8xf32>
    %237 = arith.subf %233, %236 : vector<8x8xf32>
    %238 = math.exp %237 : vector<8x8xf32>
    %cst_95 = arith.constant dense<0.000000e+00> : vector<8xf32>
    %239 = vector.multi_reduction <add>, %238, %cst_95 [1] : vector<8x8xf32> to vector<8xf32>
    %240 = vector.shape_cast %239 : vector<8xf32> to vector<8x1xf32>
    %241 = tpu.reciprocal %240 {approx = true} : vector<8x1xf32> -> vector<8x1xf32>
    %242 = vector.broadcast %241 : vector<8x1xf32> to vector<8x8xf32>
    %243 = arith.mulf %238, %242 : vector<8x8xf32>
    %244 = arith.truncf %243 : vector<8x8xf32> to vector<8x8xbf16>
    %cst_96 = arith.constant dense<0.000000e+00> : vector<8x8xf32>
    %245 = tpu.matmul %244, %230, %cst_96 {dimension_numbers = #tpu.dot_dimension_numbers<[1], [0], [0], [1], [0, 0, 1, 1], [], []>} : vector<8x8xbf16>, vector<8x8xbf16>, vector<8x8xf32> -> vector<8x8xf32>
    %246 = vector.extract_strided_slice %209 {offsets = [0, 16], sizes = [8, 8], strides = [1, 1]} : vector<8x96xbf16> to vector<8x8xbf16>
    %247 = vector.extract_strided_slice %209 {offsets = [0, 48], sizes = [8, 8], strides = [1, 1]} : vector<8x96xbf16> to vector<8x8xbf16>
    %248 = vector.extract_strided_slice %209 {offsets = [0, 80], sizes = [8, 8], strides = [1, 1]} : vector<8x96xbf16> to vector<8x8xbf16>
    %cst_97 = arith.constant dense<0.000000e+00> : vector<8x8xf32>
    %249 = tpu.matmul %246, %247, %cst_97 {dimension_numbers = #tpu.dot_dimension_numbers<[1], [1], [0], [0], [0, 0, 1, 0], [], []>} : vector<8x8xbf16>, vector<8x8xbf16>, vector<8x8xf32> -> vector<8x8xf32>
    %250 = vector.broadcast %27 : vector<1x8xf32> to vector<8x8xf32>
    %251 = arith.addf %249, %250 : vector<8x8xf32>
    %cst_98 = arith.constant dense<0xFF800000> : vector<8xf32>
    %252 = vector.multi_reduction <maximumf>, %251, %cst_98 [1] : vector<8x8xf32> to vector<8xf32>
    %253 = vector.shape_cast %252 : vector<8xf32> to vector<8x1xf32>
    %254 = vector.broadcast %253 : vector<8x1xf32> to vector<8x8xf32>
    %255 = arith.subf %251, %254 : vector<8x8xf32>
    %256 = math.exp %255 : vector<8x8xf32>
    %cst_99 = arith.constant dense<0.000000e+00> : vector<8xf32>
    %257 = vector.multi_reduction <add>, %256, %cst_99 [1] : vector<8x8xf32> to vector<8xf32>
    %258 = vector.shape_cast %257 : vector<8xf32> to vector<8x1xf32>
    %259 = tpu.reciprocal %258 {approx = true} : vector<8x1xf32> -> vector<8x1xf32>
    %260 = vector.broadcast %259 : vector<8x1xf32> to vector<8x8xf32>
    %261 = arith.mulf %256, %260 : vector<8x8xf32>
    %262 = arith.truncf %261 : vector<8x8xf32> to vector<8x8xbf16>
    %cst_100 = arith.constant dense<0.000000e+00> : vector<8x8xf32>
    %263 = tpu.matmul %262, %248, %cst_100 {dimension_numbers = #tpu.dot_dimension_numbers<[1], [0], [0], [1], [0, 0, 1, 1], [], []>} : vector<8x8xbf16>, vector<8x8xbf16>, vector<8x8xf32> -> vector<8x8xf32>
    %264 = vector.extract_strided_slice %209 {offsets = [0, 24], sizes = [8, 8], strides = [1, 1]} : vector<8x96xbf16> to vector<8x8xbf16>
    %265 = vector.extract_strided_slice %209 {offsets = [0, 56], sizes = [8, 8], strides = [1, 1]} : vector<8x96xbf16> to vector<8x8xbf16>
    %266 = vector.extract_strided_slice %209 {offsets = [0, 88], sizes = [8, 8], strides = [1, 1]} : vector<8x96xbf16> to vector<8x8xbf16>
    %cst_101 = arith.constant dense<0.000000e+00> : vector<8x8xf32>
    %267 = tpu.matmul %264, %265, %cst_101 {dimension_numbers = #tpu.dot_dimension_numbers<[1], [1], [0], [0], [0, 0, 1, 0], [], []>} : vector<8x8xbf16>, vector<8x8xbf16>, vector<8x8xf32> -> vector<8x8xf32>
    %268 = vector.broadcast %27 : vector<1x8xf32> to vector<8x8xf32>
    %269 = arith.addf %267, %268 : vector<8x8xf32>
    %cst_102 = arith.constant dense<0xFF800000> : vector<8xf32>
    %270 = vector.multi_reduction <maximumf>, %269, %cst_102 [1] : vector<8x8xf32> to vector<8xf32>
    %271 = vector.shape_cast %270 : vector<8xf32> to vector<8x1xf32>
    %272 = vector.broadcast %271 : vector<8x1xf32> to vector<8x8xf32>
    %273 = arith.subf %269, %272 : vector<8x8xf32>
    %274 = math.exp %273 : vector<8x8xf32>
    %cst_103 = arith.constant dense<0.000000e+00> : vector<8xf32>
    %275 = vector.multi_reduction <add>, %274, %cst_103 [1] : vector<8x8xf32> to vector<8xf32>
    %276 = vector.shape_cast %275 : vector<8xf32> to vector<8x1xf32>
    %277 = tpu.reciprocal %276 {approx = true} : vector<8x1xf32> -> vector<8x1xf32>
    %278 = vector.broadcast %277 : vector<8x1xf32> to vector<8x8xf32>
    %279 = arith.mulf %274, %278 : vector<8x8xf32>
    %280 = arith.truncf %279 : vector<8x8xf32> to vector<8x8xbf16>
    %cst_104 = arith.constant dense<0.000000e+00> : vector<8x8xf32>
    %281 = tpu.matmul %280, %266, %cst_104 {dimension_numbers = #tpu.dot_dimension_numbers<[1], [0], [0], [1], [0, 0, 1, 1], [], []>} : vector<8x8xbf16>, vector<8x8xbf16>, vector<8x8xf32> -> vector<8x8xf32>
    %282 = tpu.concatenate %227, %245, %263, %281 in 1 : vector<8x8xf32>, vector<8x8xf32>, vector<8x8xf32>, vector<8x8xf32> -> vector<8x32xf32>
    %283 = arith.truncf %282 : vector<8x32xf32> to vector<8x32xbf16>
    %c1_105 = arith.constant 1 : index
    %c0_106 = arith.constant 0 : index
    %c0_107 = arith.constant 0 : index
    %284 = vector.load %arg7[%c1_105, %c0_106, %c0_107] : memref<2x32x32xbf16, #tpu.memory_space<vmem>>, vector<1x32x32xbf16>
    %285 = vector.shape_cast %284 : vector<1x32x32xbf16> to vector<32x32xbf16>
    %cst_108 = arith.constant dense<0.000000e+00> : vector<8x32xf32>
    %286 = tpu.matmul %283, %285, %cst_108 {dimension_numbers = #tpu.dot_dimension_numbers<[1], [0], [0], [1], [0, 0, 1, 1], [], []>} : vector<8x32xbf16>, vector<32x32xbf16>, vector<8x32xf32> -> vector<8x32xf32>
    %c1_109 = arith.constant 1 : index
    %c0_110 = arith.constant 0 : index
    %c0_111 = arith.constant 0 : index
    %287 = vector.load %arg8[%c1_109, %c0_110, %c0_111] : memref<2x1x32xf32, #tpu.memory_space<vmem>>, vector<1x1x32xf32>
    %288 = vector.shape_cast %287 : vector<1x1x32xf32> to vector<1x32xf32>
    %289 = vector.broadcast %288 : vector<1x32xf32> to vector<8x32xf32>
    %290 = arith.addf %286, %289 : vector<8x32xf32>
    %291 = arith.addf %200, %290 : vector<8x32xf32>
    %c1_112 = arith.constant 1 : index
    %c0_113 = arith.constant 0 : index
    %c0_114 = arith.constant 0 : index
    %292 = vector.load %arg9[%c1_112, %c0_113, %c0_114] : memref<2x1x32xf32, #tpu.memory_space<vmem>>, vector<1x1x32xf32>
    %293 = vector.shape_cast %292 : vector<1x1x32xf32> to vector<1x32xf32>
    %c1_115 = arith.constant 1 : index
    %c0_116 = arith.constant 0 : index
    %c0_117 = arith.constant 0 : index
    %294 = vector.load %arg10[%c1_115, %c0_116, %c0_117] : memref<2x1x32xf32, #tpu.memory_space<vmem>>, vector<1x1x32xf32>
    %295 = vector.shape_cast %294 : vector<1x1x32xf32> to vector<1x32xf32>
    %cst_118 = arith.constant dense<0.000000e+00> : vector<8xf32>
    %296 = vector.multi_reduction <add>, %291, %cst_118 [1] : vector<8x32xf32> to vector<8xf32>
    %297 = vector.shape_cast %296 : vector<8xf32> to vector<8x1xf32>
    %cst_119 = arith.constant 3.200000e+01 : f32
    %298 = vector.broadcast %cst_119 : f32 to vector<8x1xf32>
    %299 = arith.divf %297, %298 : vector<8x1xf32>
    %300 = vector.broadcast %299 : vector<8x1xf32> to vector<8x32xf32>
    %301 = arith.subf %291, %300 : vector<8x32xf32>
    %302 = arith.mulf %301, %301 : vector<8x32xf32>
    %cst_120 = arith.constant dense<0.000000e+00> : vector<8xf32>
    %303 = vector.multi_reduction <add>, %302, %cst_120 [1] : vector<8x32xf32> to vector<8xf32>
    %304 = vector.shape_cast %303 : vector<8xf32> to vector<8x1xf32>
    %cst_121 = arith.constant 3.200000e+01 : f32
    %305 = vector.broadcast %cst_121 : f32 to vector<8x1xf32>
    %306 = arith.divf %304, %305 : vector<8x1xf32>
    %307 = vector.broadcast %299 : vector<8x1xf32> to vector<8x32xf32>
    %308 = arith.subf %291, %307 : vector<8x32xf32>
    %cst_122 = arith.constant 9.99999974E-6 : f32
    %309 = vector.broadcast %cst_122 : f32 to vector<8x1xf32>
    %310 = arith.addf %306, %309 : vector<8x1xf32>
    %311 = math.rsqrt %310 : vector<8x1xf32>
    %312 = vector.broadcast %311 : vector<8x1xf32> to vector<8x32xf32>
    %313 = arith.mulf %308, %312 : vector<8x32xf32>
    %314 = vector.broadcast %293 : vector<1x32xf32> to vector<8x32xf32>
    %315 = arith.mulf %313, %314 : vector<8x32xf32>
    %316 = vector.broadcast %295 : vector<1x32xf32> to vector<8x32xf32>
    %317 = arith.addf %315, %316 : vector<8x32xf32>
    %318 = arith.truncf %317 : vector<8x32xf32> to vector<8x32xbf16>
    %c1_123 = arith.constant 1 : index
    %c0_124 = arith.constant 0 : index
    %c0_125 = arith.constant 0 : index
    %319 = vector.load %arg11[%c1_123, %c0_124, %c0_125] : memref<2x32x64xbf16, #tpu.memory_space<vmem>>, vector<1x32x64xbf16>
    %320 = vector.shape_cast %319 : vector<1x32x64xbf16> to vector<32x64xbf16>
    %cst_126 = arith.constant dense<0.000000e+00> : vector<8x64xf32>
    %321 = tpu.matmul %318, %320, %cst_126 {dimension_numbers = #tpu.dot_dimension_numbers<[1], [0], [0], [1], [0, 0, 1, 1], [], []>} : vector<8x32xbf16>, vector<32x64xbf16>, vector<8x64xf32> -> vector<8x64xf32>
    %c1_127 = arith.constant 1 : index
    %c0_128 = arith.constant 0 : index
    %c0_129 = arith.constant 0 : index
    %322 = vector.load %arg12[%c1_127, %c0_128, %c0_129] : memref<2x1x64xf32, #tpu.memory_space<vmem>>, vector<1x1x64xf32>
    %323 = vector.shape_cast %322 : vector<1x1x64xf32> to vector<1x64xf32>
    %324 = vector.broadcast %323 : vector<1x64xf32> to vector<8x64xf32>
    %325 = arith.addf %321, %324 : vector<8x64xf32>
    %cst_130 = arith.constant 5.000000e-01 : f32
    %326 = vector.broadcast %cst_130 : f32 to vector<8x64xf32>
    %327 = arith.mulf %326, %325 : vector<8x64xf32>
    %cst_131 = arith.constant 4.471500e-02 : f32
    %328 = vector.broadcast %cst_131 : f32 to vector<8x64xf32>
    %329 = arith.mulf %328, %325 : vector<8x64xf32>
    %330 = arith.mulf %329, %325 : vector<8x64xf32>
    %331 = arith.mulf %330, %325 : vector<8x64xf32>
    %332 = arith.addf %325, %331 : vector<8x64xf32>
    %cst_132 = arith.constant 0.797884583 : f32
    %333 = vector.broadcast %cst_132 : f32 to vector<8x64xf32>
    %334 = arith.mulf %333, %332 : vector<8x64xf32>
    %335 = math.tanh %334 : vector<8x64xf32>
    %cst_133 = arith.constant 1.000000e+00 : f32
    %336 = vector.broadcast %cst_133 : f32 to vector<8x64xf32>
    %337 = arith.addf %336, %335 : vector<8x64xf32>
    %338 = arith.mulf %327, %337 : vector<8x64xf32>
    %339 = arith.truncf %338 : vector<8x64xf32> to vector<8x64xbf16>
    %c1_134 = arith.constant 1 : index
    %c0_135 = arith.constant 0 : index
    %c0_136 = arith.constant 0 : index
    %340 = vector.load %arg13[%c1_134, %c0_135, %c0_136] : memref<2x64x32xbf16, #tpu.memory_space<vmem>>, vector<1x64x32xbf16>
    %341 = vector.shape_cast %340 : vector<1x64x32xbf16> to vector<64x32xbf16>
    %cst_137 = arith.constant dense<0.000000e+00> : vector<8x32xf32>
    %342 = tpu.matmul %339, %341, %cst_137 {dimension_numbers = #tpu.dot_dimension_numbers<[1], [0], [0], [1], [0, 0, 1, 1], [], []>} : vector<8x64xbf16>, vector<64x32xbf16>, vector<8x32xf32> -> vector<8x32xf32>
    %c1_138 = arith.constant 1 : index
    %c0_139 = arith.constant 0 : index
    %c0_140 = arith.constant 0 : index
    %343 = vector.load %arg14[%c1_138, %c0_139, %c0_140] : memref<2x1x32xf32, #tpu.memory_space<vmem>>, vector<1x1x32xf32>
    %344 = vector.shape_cast %343 : vector<1x1x32xf32> to vector<1x32xf32>
    %345 = vector.broadcast %344 : vector<1x32xf32> to vector<8x32xf32>
    %346 = arith.addf %342, %345 : vector<8x32xf32>
    %347 = arith.addf %317, %346 : vector<8x32xf32>
    %c1_141 = arith.constant 1 : index
    %c0_142 = arith.constant 0 : index
    %c0_143 = arith.constant 0 : index
    %348 = vector.load %arg15[%c1_141, %c0_142, %c0_143] : memref<2x1x32xf32, #tpu.memory_space<vmem>>, vector<1x1x32xf32>
    %349 = vector.shape_cast %348 : vector<1x1x32xf32> to vector<1x32xf32>
    %c1_144 = arith.constant 1 : index
    %c0_145 = arith.constant 0 : index
    %c0_146 = arith.constant 0 : index
    %350 = vector.load %arg16[%c1_144, %c0_145, %c0_146] : memref<2x1x32xf32, #tpu.memory_space<vmem>>, vector<1x1x32xf32>
    %351 = vector.shape_cast %350 : vector<1x1x32xf32> to vector<1x32xf32>
    %cst_147 = arith.constant dense<0.000000e+00> : vector<8xf32>
    %352 = vector.multi_reduction <add>, %347, %cst_147 [1] : vector<8x32xf32> to vector<8xf32>
    %353 = vector.shape_cast %352 : vector<8xf32> to vector<8x1xf32>
    %cst_148 = arith.constant 3.200000e+01 : f32
    %354 = vector.broadcast %cst_148 : f32 to vector<8x1xf32>
    %355 = arith.divf %353, %354 : vector<8x1xf32>
    %356 = vector.broadcast %355 : vector<8x1xf32> to vector<8x32xf32>
    %357 = arith.subf %347, %356 : vector<8x32xf32>
    %358 = arith.mulf %357, %357 : vector<8x32xf32>
    %cst_149 = arith.constant dense<0.000000e+00> : vector<8xf32>
    %359 = vector.multi_reduction <add>, %358, %cst_149 [1] : vector<8x32xf32> to vector<8xf32>
    %360 = vector.shape_cast %359 : vector<8xf32> to vector<8x1xf32>
    %cst_150 = arith.constant 3.200000e+01 : f32
    %361 = vector.broadcast %cst_150 : f32 to vector<8x1xf32>
    %362 = arith.divf %360, %361 : vector<8x1xf32>
    %363 = vector.broadcast %355 : vector<8x1xf32> to vector<8x32xf32>
    %364 = arith.subf %347, %363 : vector<8x32xf32>
    %cst_151 = arith.constant 9.99999974E-6 : f32
    %365 = vector.broadcast %cst_151 : f32 to vector<8x1xf32>
    %366 = arith.addf %362, %365 : vector<8x1xf32>
    %367 = math.rsqrt %366 : vector<8x1xf32>
    %368 = vector.broadcast %367 : vector<8x1xf32> to vector<8x32xf32>
    %369 = arith.mulf %364, %368 : vector<8x32xf32>
    %370 = vector.broadcast %349 : vector<1x32xf32> to vector<8x32xf32>
    %371 = arith.mulf %369, %370 : vector<8x32xf32>
    %372 = vector.broadcast %351 : vector<1x32xf32> to vector<8x32xf32>
    %373 = arith.addf %371, %372 : vector<8x32xf32>
    %cst_152 = arith.constant 0.000000e+00 : f32
    %374 = vector.broadcast %cst_152 : f32 to vector<8x96xf32>
    %375 = tpu.concatenate %373, %374 in 1 : vector<8x32xf32>, vector<8x96xf32> -> vector<8x128xf32>
    %c0_153 = arith.constant 0 : index
    %c0_154 = arith.constant 0 : index
    %c0_155 = arith.constant 0 : index
    %376 = vector.load %arg19[%c0_153, %c0_154, %c0_155] : memref<1x8x128xf32, #tpu.memory_space<vmem>>, vector<1x8x128xf32>
    %377 = vector.shape_cast %376 : vector<1x8x128xf32> to vector<8x128xf32>
    %378 = vector.shape_cast %375 : vector<8x128xf32> to vector<1x8x128xf32>
    tpu.vector_store %arg19[%c0_153, %c0_154, %c0_155], %378 {strides = array<i32>} : memref<1x8x128xf32, #tpu.memory_space<vmem>>, vector<1x8x128xf32>,
    %379 = vector.extract_strided_slice %373 {offsets = [0, 0], sizes = [1, 32], strides = [1, 1]} : vector<8x32xf32> to vector<1x32xf32>
    %380 = arith.truncf %379 : vector<1x32xf32> to vector<1x32xbf16>
    %c0_156 = arith.constant 0 : index
    %c0_157 = arith.constant 0 : index
    %381 = vector.load %arg17[%c0_156, %c0_157] : memref<32x128xbf16, #tpu.memory_space<vmem>>, vector<32x128xbf16>
    %cst_158 = arith.constant dense<0.000000e+00> : vector<1x128xf32>
    %382 = tpu.matmul %380, %381, %cst_158 {dimension_numbers = #tpu.dot_dimension_numbers<[1], [0], [0], [1], [0, 0, 1, 1], [], []>} : vector<1x32xbf16>, vector<32x128xbf16>, vector<1x128xf32> -> vector<1x128xf32>
    %c0_159 = arith.constant 0 : index
    %c0_160 = arith.constant 0 : index
    %383 = vector.load %arg18[%c0_159, %c0_160] : memref<1x128xf32, #tpu.memory_space<vmem>>, vector<1x128xf32>
    %384 = arith.addf %382, %383 : vector<1x128xf32>
    %385 = math.tanh %384 : vector<1x128xf32>
    %c0_161 = arith.constant 0 : index
    %c0_162 = arith.constant 0 : index
    %c0_163 = arith.constant 0 : index
    %386 = vector.load %arg20[%c0_161, %c0_162, %c0_163] : memref<1x1x128xf32, #tpu.memory_space<vmem>>, vector<1x1x128xf32>
    %387 = vector.shape_cast %386 : vector<1x1x128xf32> to vector<1x128xf32>
    %388 = vector.shape_cast %385 : vector<1x128xf32> to vector<1x1x128xf32>
    tpu.vector_store %arg20[%c0_161, %c0_162, %c0_163], %388 {strides = array<i32>} : memref<1x1x128xf32, #tpu.memory_space<vmem>>, vector<1x1x128xf32>,
    return
  }
  func.func @transform_0(%arg0: i32) -> (i32, i32, i32) {
    %c0_i32 = arith.constant 0 : i32
    %c0_i32_0 = arith.constant 0 : i32
    %c0_i32_1 = arith.constant 0 : i32
    return %arg0, %c0_i32, %c0_i32_0 : i32, i32, i32
  }
  func.func @transform_1(%arg0: i32) -> (i32, i32, i32) {
    %c0_i32 = arith.constant 0 : i32
    %c0_i32_0 = arith.constant 0 : i32
    %c0_i32_1 = arith.constant 0 : i32
    return %arg0, %c0_i32, %c0_i32_0 : i32, i32, i32
  }
  func.func @transform_2(%arg0: i32) -> (i32, i32) {
    %c0_i32 = arith.constant 0 : i32
    %c0_i32_0 = arith.constant 0 : i32
    %c0_i32_1 = arith.constant 0 : i32
    return %c0_i32, %c0_i32_0 : i32, i32
  }
  func.func @transform_3(%arg0: i32) -> (i32, i32) {
    %c0_i32 = arith.constant 0 : i32
    %c0_i32_0 = arith.constant 0 : i32
    %c0_i32_1 = arith.constant 0 : i32
    return %c0_i32, %c0_i32_0 : i32, i32
  }
  func.func @transform_4(%arg0: i32) -> (i32, i32, i32) {
    %c0_i32 = arith.constant 0 : i32
    %c0_i32_0 = arith.constant 0 : i32
    %c0_i32_1 = arith.constant 0 : i32
    %c0_i32_2 = arith.constant 0 : i32
    return %c0_i32, %c0_i32_0, %c0_i32_1 : i32, i32, i32
  }
  func.func @transform_5(%arg0: i32) -> (i32, i32, i32) {
    %c0_i32 = arith.constant 0 : i32
    %c0_i32_0 = arith.constant 0 : i32
    %c0_i32_1 = arith.constant 0 : i32
    %c0_i32_2 = arith.constant 0 : i32
    return %c0_i32, %c0_i32_0, %c0_i32_1 : i32, i32, i32
  }
  func.func @transform_6(%arg0: i32) -> (i32, i32, i32) {
    %c0_i32 = arith.constant 0 : i32
    %c0_i32_0 = arith.constant 0 : i32
    %c0_i32_1 = arith.constant 0 : i32
    %c0_i32_2 = arith.constant 0 : i32
    return %c0_i32, %c0_i32_0, %c0_i32_1 : i32, i32, i32
  }
  func.func @transform_7(%arg0: i32) -> (i32, i32, i32) {
    %c0_i32 = arith.constant 0 : i32
    %c0_i32_0 = arith.constant 0 : i32
    %c0_i32_1 = arith.constant 0 : i32
    %c0_i32_2 = arith.constant 0 : i32
    return %c0_i32, %c0_i32_0, %c0_i32_1 : i32, i32, i32
  }
  func.func @transform_8(%arg0: i32) -> (i32, i32, i32) {
    %c0_i32 = arith.constant 0 : i32
    %c0_i32_0 = arith.constant 0 : i32
    %c0_i32_1 = arith.constant 0 : i32
    %c0_i32_2 = arith.constant 0 : i32
    return %c0_i32, %c0_i32_0, %c0_i32_1 : i32, i32, i32
  }
  func.func @transform_9(%arg0: i32) -> (i32, i32, i32) {
    %c0_i32 = arith.constant 0 : i32
    %c0_i32_0 = arith.constant 0 : i32
    %c0_i32_1 = arith.constant 0 : i32
    %c0_i32_2 = arith.constant 0 : i32
    return %c0_i32, %c0_i32_0, %c0_i32_1 : i32, i32, i32
  }
  func.func @transform_10(%arg0: i32) -> (i32, i32, i32) {
    %c0_i32 = arith.constant 0 : i32
    %c0_i32_0 = arith.constant 0 : i32
    %c0_i32_1 = arith.constant 0 : i32
    %c0_i32_2 = arith.constant 0 : i32
    return %c0_i32, %c0_i32_0, %c0_i32_1 : i32, i32, i32
  }
  func.func @transform_11(%arg0: i32) -> (i32, i32, i32) {
    %c0_i32 = arith.constant 0 : i32
    %c0_i32_0 = arith.constant 0 : i32
    %c0_i32_1 = arith.constant 0 : i32
    %c0_i32_2 = arith.constant 0 : i32
    return %c0_i32, %c0_i32_0, %c0_i32_1 : i32, i32, i32
  }
  func.func @transform_12(%arg0: i32) -> (i32, i32, i32) {
    %c0_i32 = arith.constant 0 : i32
    %c0_i32_0 = arith.constant 0 : i32
    %c0_i32_1 = arith.constant 0 : i32
    %c0_i32_2 = arith.constant 0 : i32
    return %c0_i32, %c0_i32_0, %c0_i32_1 : i32, i32, i32
  }
  func.func @transform_13(%arg0: i32) -> (i32, i32, i32) {
    %c0_i32 = arith.constant 0 : i32
    %c0_i32_0 = arith.constant 0 : i32
    %c0_i32_1 = arith.constant 0 : i32
    %c0_i32_2 = arith.constant 0 : i32
    return %c0_i32, %c0_i32_0, %c0_i32_1 : i32, i32, i32
  }
  func.func @transform_14(%arg0: i32) -> (i32, i32, i32) {
    %c0_i32 = arith.constant 0 : i32
    %c0_i32_0 = arith.constant 0 : i32
    %c0_i32_1 = arith.constant 0 : i32
    %c0_i32_2 = arith.constant 0 : i32
    return %c0_i32, %c0_i32_0, %c0_i32_1 : i32, i32, i32
  }
  func.func @transform_15(%arg0: i32) -> (i32, i32, i32) {
    %c0_i32 = arith.constant 0 : i32
    %c0_i32_0 = arith.constant 0 : i32
    %c0_i32_1 = arith.constant 0 : i32
    %c0_i32_2 = arith.constant 0 : i32
    return %c0_i32, %c0_i32_0, %c0_i32_1 : i32, i32, i32
  }
  func.func @transform_16(%arg0: i32) -> (i32, i32) {
    %c0_i32 = arith.constant 0 : i32
    %c0_i32_0 = arith.constant 0 : i32
    %c0_i32_1 = arith.constant 0 : i32
    return %c0_i32, %c0_i32_0 : i32, i32
  }
  func.func @transform_17(%arg0: i32) -> (i32, i32) {
    %c0_i32 = arith.constant 0 : i32
    %c0_i32_0 = arith.constant 0 : i32
    %c0_i32_1 = arith.constant 0 : i32
    return %c0_i32, %c0_i32_0 : i32, i32
  }
  func.func @transform_18(%arg0: i32) -> (i32, i32, i32) {
    %c0_i32 = arith.constant 0 : i32
    %c0_i32_0 = arith.constant 0 : i32
    %c0_i32_1 = arith.constant 0 : i32
    return %arg0, %c0_i32, %c0_i32_0 : i32, i32, i32
  }
  func.func @transform_19(%arg0: i32) -> (i32, i32, i32) {
    %c0_i32 = arith.constant 0 : i32
    %c0_i32_0 = arith.constant 0 : i32
    %c0_i32_1 = arith.constant 0 : i32
    return %arg0, %c0_i32, %c0_i32_0 : i32, i32, i32
  }
}

</mosaic_0001>

<bundles_post_ra>
// kernel: roberta_forward.1
= control target key start
LH: loop header
LB: loop body
LE: loop exit
PB: predicated region body
PF: predicated region fallthrough
CT: control target
= control target key end

     0   :  { %s3672_s0 = inlined_call_operand.vmem [shape: f32[2,8,32], index: 0, kind: input, shape index: {}]   ;;  %s3673_s1 = inlined_call_operand.vmem [shape: f32[2,1,8], index: 1, kind: input, shape index: {}]   ;;  %s3674_s2 = inlined_call_operand.vmem [shape: f32[1,32], index: 2, kind: input, shape index: {}]   ;;  %s3675_s3 = inlined_call_operand.vmem [shape: f32[1,32], index: 3, kind: input, shape index: {}]   ;;  %s3676_s4 = inlined_call_operand.vmem [shape: bf16[2,32,96], index: 4, kind: input, shape index: {}]   ;;  %s3677_s5 = inlined_call_operand.vmem [shape: f32[2,1,96], index: 5, kind: input, shape index: {}]   ;;  %s3678_s6 = inlined_call_operand.vmem [shape: bf16[2,32,32], index: 6, kind: input, shape index: {}]   ;;  %s3679_s7 = inlined_call_operand.vmem [shape: f32[2,1,32], index: 7, kind: input, shape index: {}]   ;;  %s3680_s8 = inlined_call_operand.vmem [shape: f32[2,1,32], index: 8, kind: input, shape index: {}]   ;;  %s3681_s9 = inlined_call_operand.vmem [shape: f32[2,1,32], index: 9, kind: input, shape index: {}]   ;;  %s3682_s10 = inlined_call_operand.vmem [shape: bf16[2,32,64], index: 10, kind: input, shape index: {}]   ;;  %s3683_s11 = inlined_call_operand.vmem [shape: f32[2,1,64], index: 11, kind: input, shape index: {}]   ;;  %s3684_s12 = inlined_call_operand.vmem [shape: bf16[2,64,32], index: 12, kind: input, shape index: {}]   ;;  %s3685_s13 = inlined_call_operand.vmem [shape: f32[2,1,32], index: 13, kind: input, shape index: {}]   ;;  %s3686_s14 = inlined_call_operand.vmem [shape: f32[2,1,32], index: 14, kind: input, shape index: {}]   ;;  %s3687_s15 = inlined_call_operand.vmem [shape: f32[2,1,32], index: 15, kind: input, shape index: {}]   ;;  %s3688_s16 = inlined_call_operand.vmem [shape: bf16[32,128], index: 16, kind: input, shape index: {}]   ;;  %s3689_s17 = inlined_call_operand.vmem [shape: f32[1,128], index: 17, kind: input, shape index: {}]   ;;  %s3690_s18 = inlined_call_operand.hbm [shape: f32[2,8,128], index: 18, kind: output, shape index: {0}]   ;;  %s3691_s19 = inlined_call_operand.hbm [shape: f32[2,1,128], index: 19, kind: output, shape index: {1}]  }
   0x1   :  { %3708 = sst [smem:[#allocation11_spill]] %s3672_s0 }
   0x2   :  { %3709 = sst [smem:[#allocation12_spill]] %s3673_s1 }
   0x3   :  { %3710 = sst [smem:[#allocation13_spill]] %s3674_s2 }
   0x4   :  { %3711 = sst [smem:[#allocation14_spill]] %s3675_s3 }
   0x5   :  { %3712 = sst [smem:[#allocation15_spill]] %s3676_s4 }
   0x6   :  { %3713 = sst [smem:[#allocation16_spill]] %s3677_s5 }
   0x7   :  { %3714 = sst [smem:[#allocation17_spill]] %s3678_s6 }
   0x8   :  { %25 = vsyncpa [#allocation3], 0 }
   0x9   :  { %27 = vsyncpa [#allocation3 + $0x1], 0 }
   0xa   :  { %28 = vsyncpa [#allocation5], 0 }
   0xb   :  { %30 = vsyncpa [#allocation5 + $0x1], 0  ;;  %s3175_s0 = smov 0   ;;  %s3177_s30 = smov 0  }
   0xc   :  { %s3179_s20 = smov 0   ;;  %s3181_s21 = smov 0  }
   0xd LB: > { %3715 = sst [smem:[#allocation8_spill]] %s3051_s20  ;;  %s3196_s1 = sadd.s32 4294967295, %s3055_s21   ;;  %s3055_s21 = sphi %s3181_s21, %s3740_s21   ;;  %s3051_s20 = sphi %s3179_s20, %s3742_s20   ;;  %s3047_s30 = sphi %s3177_s30, %s3744_s30   ;;  %s3043_s0 = sphi %s3175_s0, %s3743_s0  }
   0xe   : > { %s2487_s22 = sadd.s32 4294967294, %s3055_s21   ;;  %s3200_s2 = sadd.s32 1, %s3055_s21  }
   0xf   : > { %3716 = sst [smem:[#allocation9_spill]] %s3200_s2  ;;  %s431_s23 = sadd.s32 1, %s3051_s20 }
  0x10   : > { %s428_s24 = ssub.s32 %s3055_s21, %s3200_s2  ;;  %p441_p0 = scmp.ne.s32.totalorder %s3051_s20, %s3047_s30 }
  0x11   : > { %p429_p1 = scmp.eq.s32.totalorder %s428_s24, 0  ;;  %p442_p2 = scmp.eq.s32.totalorder %s3196_s1, 1 }
  0x12   : > { %p447_p3 = scmp.ne.s32.totalorder %s3047_s30, %s3043_s0  ;;  %p448_p4 = scmp.eq.s32.totalorder %s2487_s22, 1 }
  0x13   : > { %s3211_s25 = scalar_select %p429_p1, %s3051_s20, %s431_s23  }
  0x14   : > { %p3213_p5 = por %p442_p2, %p441_p0  ;;  %p3217_p6 = por %p448_p4, %p447_p3 }
  0x15   : > { %3717 = sst [smem:[#allocation10_spill]] %s3211_s25  ;;  %p2490_p7 = scmp.ge.s32.totalorder %s3055_s21, 1 }
  0x16   : > { %p553_p8 = scmp.lt.s32.totalorder %s3055_s21, 3 }
  0x18   : > { %p554_p9 = pnand %p2490_p7, %p553_p8 }
  0x19   : > { %p615_p10 = scmp.lt.s32.totalorder (!%p554_p9), %s3196_s1, 1  ;;  %vm626_vm0 = vcmask (!%p554_p9), 261120   ;;  %s3720_s23 = sld [smem:[#allocation11_spill]] (!%p554_p9)  ;;  %v3057_v8 = vmov (!%p554_p9), 0.0   ;;  %vm3058_vm1 = vmmov (!%p554_p9), 0   ;;  %vm733_vm2 = vcmask (!%p554_p9), 64512  }
  0x1a   : > { %557 = sbr.rel (%p554_p9) target bundleno = 5718 (0x1656), region = 92  ;;  %s3721_s4 = sld [smem:[#allocation15_spill]] (!%p554_p9)  ;;  %2655 = vmatprep.subr.bf16.mxu0 (!%p554_p9), %v3057_v8  ;;  %2663 = vmatprep.subr.bf16.mxu1 (!%p554_p9), %v3057_v8  ;;  %vm797_vm3 = vcmask (!%p554_p9), 1043456   ;;  %vm1184_vm4 = vcmask (!%p554_p9), 130048   ;;  %vm1186_vm5 = vcmask (!%p554_p9), 195584   ;;  %vm1401_vm6 = vcmask (!%p554_p9), 523264  }
  0x1b   : > { %2659 = vmatprep.mubr.msk.bf16.mxu0 (!%p554_p9), %vm3058_vm1, %v3057_v8  ;;  %2665 = vmatprep.mubr.msk.bf16.mxu1 (!%p554_p9), %vm3058_vm1, %v3057_v8  ;;  %s3722_s22 = sld [smem:[#allocation13_spill]] (!%p554_p9)  ;;  %s3724_s5 = sld [smem:[#allocation16_spill]] (!%p554_p9) }
  0x1c   : > { %s3706_s20 = smov (!%p554_p9), 120   ;;  %s3707_s25 = smov (!%p554_p9), 96  }
  0x1d   : > { %s3702_s2 = smov (!%p554_p9), 80   ;;  %s3705_s29 = smov (!%p554_p9), 8  }
  0x1e   : > { %s3726_s6 = sld [smem:[#allocation17_spill]] (!%p554_p9) }
  0x20   : > { %v2891_v7 = vld [vmem:[%s3721_s4] sm:$0xff] (!%p554_p9)   ;;  %v2892_v9 = vld [vmem:[%s3721_s4 + $0x8] sm:$0xff] (!%p554_p9)  }
  0x21   : > { %s3225_s27 = scalar_select %p615_p10, %s3196_s1, 1  ;;  %2656 = vmatpush3.bf16.msra.mxu0 %v2891_v7  ;;  %v2493_v14 = vld [vmem:[%s3722_s22] ss:$0 sm:$0xff] }
  0x22   : > { %2657 = vmatprep.subr.bf16.mxu0 %v3057_v8  ;;  %v2495_v20 = vld [vmem:[%s3724_s5] ss:$0 sm:$0xff]  ;;  %s3061_s22 = smov 88  }
  0x23   : > { %s2492_s28 = sshll.u32 %s3225_s27, 3 }
  0x24   : > { %s618_s24 = scalar_lea.vmem %s3720_s23, %s2492_s28  ;;  %s3723_s28 = sld [smem:[#allocation14_spill]] }
  0x25   : > { %v623_v0 = vld [vmem:[%s618_s24] sm:$0xff]  ;;  %2658 = vmatpush3.bf16.msra.mxu0 %v2892_v9  ;;  %s3697_s23 = smov 112   ;;  %s3696_s24 = smov 72  }
  0x26   : > { %v627_v1 = vsel %vm626_vm0, %v623_v0, 0.0  ;;  %2669 = vmatprep.subr.bf16.mxu0 %v3057_v8 }
  0x27   : > { %628 = vadd.xlane.f32.xlu0 %v627_v1 }
  0x2a   : > { %v2494_v16 = vld [vmem:[%s3723_s28] ss:$0 sm:$0xff]  ;;  %s3695_s28 = smov 104  }
  0xb4   : > { %v629_v2 = vpop.xlane.xlu0 %628 }
  0xb5   : > { %v631_v3 = vmul.f32 0.03125, %v629_v2 }
  0xb7   : > { %v632_v4 = vsub.f32 %v623_v0, %v631_v3 }
  0xb9   : > { %v633_v5 = vmul.f32 %v632_v4, %v632_v4 }
  0xbb   : > { %v634_v6 = vsel %vm626_vm0, %v633_v5, 0.0 }
  0xbc   : > { %635 = vadd.xlane.f32.xlu0 %v634_v6 }
 0x149   : > { %v636_v10 = vpop.xlane.xlu0 %635 }
 0x14a   : > { %v637_v11 = vmul.f32 0.03125, %v636_v10 }
 0x14c   : > { %v638_v12 = vadd.f32 1e-05, %v637_v11 }
 0x14e   : > { %2913 = vrsqrt.f32 %v638_v12 }
 0x158   : > { %v2914_v13 = vpop.eup %2913 }
 0x159   : > { %v640_v15 = vmul.f32 %v2914_v13, %v632_v4 }
 0x15b   : > { %v647_v17 = vmul.f32 %v2493_v14, %v640_v15 }
 0x15d   : > { %v3253_v18 = vadd.f32 %v2494_v16, %v647_v17 }
 0x15f   : > { %v656_v19 = vpack.c.bf16 %v3253_v18, %v3253_v18 }
 0x161   : > { %2660 = vmatmul.mubr.msk.bf16.vlgmr.msra.gmra.mrb[0].mxu0 %vm626_vm0, %v656_v19 }
 0x162   : > { %2671 = vmatprep.mubr.msk.bf16.mxu0 %vm3058_vm1, %v3057_v8 }
 0x234   : > { %v717_v21 = vpop.f32.mrb[0].mxu0 }
 0x235   : > { %v718_v22 = vadd.f32 %v2495_v20, %v717_v21  ;;  %v2661_v23 = vpop.f32.mrb[1].mxu0 }
 0x236   : > { %v720_v24 = vpop.f32.mrb[2].mxu0 }
 0x237   : > { %v3263_v25 = vpack.c.bf16 %v718_v22, %v718_v22  ;;  %v2662_v26 = vpop.f32.mrb[3].mxu0 }
 0x239   : > { %841 = vrot.lane.b32.xlu0 %v3263_v25, %s3706_s20  ;;  %731 = vrot.lane.b32.xlu1 %v3263_v25, %s3707_s25  ;;  %s3731_s20 = smov 72   ;;  %s3732_s25 = smov 104  }
 0x23d   : > { %843 = vrot.lane.b32.xlu1 %v3263_v25, %s3061_s22 }
 0x241   : > { %953 = vrot.lane.b32.xlu1 %v3263_v25, %s3702_s2  ;;  %s3704_s2 = smov 16  }
 0x245   : > { %951 = vrot.lane.b32.xlu1 %v3263_v25, %s3697_s23 }
 0x249   : > { %1063 = vrot.lane.b32.xlu1 %v3263_v25, %s3696_s24  ;;  %s3725_s24 = sld [smem:[#allocation12_spill]] }
 0x24d   : > { %1061 = vrot.lane.b32.xlu1 %v3263_v25, %s3695_s28  ;;  %s3698_s28 = smov 40  }
 0x24f   : > { %s621_s23 = scalar_lea.vmem %s3725_s24, %s3225_s27  ;;  %s3701_s27 = smov 64  }
 0x250   : > { %v3304_v38 = vld [vmem:[%s621_s23] ss:$0 sm:$0xff]  ;;  %s3700_s23 = smov 56   ;;  %s3699_s24 = smov 48  }
 0x2ab   : > { %v732_v27 = vpop.permute.xlu1 %731  ;;  %v842_v32 = vpop.permute.xlu0 %841 }
 0x2ac   : > { %v738_v28 = vsel %vm733_vm2, %v732_v27, 0 }
 0x2ad   : > { %2664 = vmatpush3.bf16.xpose.msra.mxu1 %v738_v28 }
 0x2ae   : > { %2675 = vmatprep.subr.bf16.mxu1 %v3057_v8 }
 0x2af   : > { %v844_v29 = vpop.permute.xlu1 %843 }
 0x2b0   : > { %v849_v30 = vsel %vm733_vm2, %v844_v29, 0 }
 0x2b3   : > { %v954_v31 = vpop.permute.xlu1 %953 }
 0x2b4   : > { %2666 = vmatmul.mubr.msk.bf16.vlgmr.msra.gmra.mrb[0].mxu1 %vm733_vm2, %v3263_v25  ;;  %v959_v34 = vsel %vm733_vm2, %v954_v31, 0 }
 0x2b5   : > { %2676 = vmatpush3.bf16.xpose.msra.mxu1 %v849_v30  ;;  %2677 = vmatprep.mubr.msk.bf16.mxu1 %vm3058_vm1, %v3057_v8 }
 0x2b6   : > { %2687 = vmatprep.subr.bf16.mxu1 %v3057_v8 }
 0x2b7   : > { %v952_v33 = vpop.permute.xlu1 %951 }
 0x2bb   : > { %v1064_v35 = vpop.permute.xlu1 %1063 }
 0x2bc   : > { %2678 = vmatmul.mubr.msk.bf16.vlgmr.msra.gmra.mrb[4].mxu1 %vm733_vm2, %v842_v32  ;;  %v1069_v36 = vsel %vm733_vm2, %v1064_v35, 0 }
 0x2bd   : > { %2688 = vmatpush3.bf16.xpose.msra.mxu1 %v959_v34  ;;  %2689 = vmatprep.mubr.msk.bf16.mxu1 %vm3058_vm1, %v3057_v8 }
 0x2be   : > { %2699 = vmatprep.subr.bf16.mxu1 %v3057_v8 }
 0x2bf   : > { %v1062_v37 = vpop.permute.xlu1 %1061 }
 0x2c4   : > { %2690 = vmatmul.mubr.msk.bf16.vlgmr.msra.gmra.mrb[8].mxu1 %vm733_vm2, %v952_v33 }
 0x2c5   : > { %2700 = vmatpush3.bf16.xpose.msra.mxu1 %v1069_v36  ;;  %2701 = vmatprep.mubr.msk.bf16.mxu1 %vm3058_vm1, %v3057_v8 }
 0x2c6   : > { %2711 = vmatprep.subr.bf16.mxu1 %v3057_v8 }
 0x2cc   : > { %2702 = vmatmul.mubr.msk.bf16.vlgmr.msra.gmra.mrb[12].mxu1 %vm733_vm2, %v1062_v37 }
 0x2cd   : > { %2715 = vmatprep.mubr.msk.bf16.mxu1 %vm3058_vm1, %v3057_v8 }
 0x387   : > { %v774_v39 = vpop.f32.mrb[0].mxu1 }
 0x388   : > { %v775_v40 = vadd.f32 %v3304_v38, %v774_v39  ;;  %v2667_v41 = vpop.f32.mrb[1].mxu1 }
 0x389   : > { %v777_v42 = vpop.f32.mrb[2].mxu1 }
 0x38a   : > { %v2668_v43 = vpop.f32.mrb[3].mxu1  ;;  %v780_v44 = vsel %vm733_vm2, %v775_v40, -inf }
 0x38b   : > { %781 = vmax.xlane.f32.xlu1 %v780_v44 }
 0x38f   : > { %v885_v45 = vpop.f32.mrb[4].mxu1 }
 0x390   : > { %v886_v46 = vadd.f32 %v3304_v38, %v885_v45  ;;  %v2679_v47 = vpop.f32.mrb[5].mxu1 }
 0x391   : > { %v888_v48 = vpop.f32.mrb[6].mxu1 }
 0x392   : > { %v2680_v49 = vpop.f32.mrb[7].mxu1  ;;  %v891_v50 = vsel %vm733_vm2, %v886_v46, -inf }
 0x393   : > { %892 = vmax.xlane.f32.xlu0 %v891_v50 }
 0x397   : > { %v995_v51 = vpop.f32.mrb[8].mxu1 }
 0x398   : > { %v996_v52 = vadd.f32 %v3304_v38, %v995_v51  ;;  %v2691_v53 = vpop.f32.mrb[9].mxu1 }
 0x399   : > { %v998_v54 = vpop.f32.mrb[10].mxu1 }
 0x39a   : > { %v2692_v55 = vpop.f32.mrb[11].mxu1  ;;  %v1001_v56 = vsel %vm733_vm2, %v996_v52, -inf  ;;  %v2893_v54 = vld [vmem:[%s3726_s6] sm:$0xff]  }
 0x39b   : > { %1002 = vmax.xlane.f32.xlu1 %v1001_v56  ;;  %2712 = vmatpush3.bf16.msra.mxu1 %v2893_v54  ;;  %v2894_v55 = vld [vmem:[%s3726_s6 + $0x8] sm:$0xff]   ;;  %v2518_v54 = vld [vmem:[%s3685_s13] ss:$0 sm:$0xff] }
 0x39c   : > { %2713 = vmatprep.subr.bf16.mxu1 %v3057_v8 }
 0x39f   : > { %v1105_v57 = vpop.f32.mrb[12].mxu1  ;;  %2714 = vmatpush3.bf16.msra.mxu1 %v2894_v55 }
 0x3a0   : > { %v1106_v58 = vadd.f32 %v3304_v38, %v1105_v57  ;;  %v2703_v59 = vpop.f32.mrb[13].mxu1  ;;  %2727 = vmatprep.subr.bf16.mxu1 %v3057_v8 }
 0x3a1   : > { %v1108_v60 = vpop.f32.mrb[14].mxu1 }
 0x3a2   : > { %v2704_v61 = vpop.f32.mrb[15].mxu1  ;;  %v1111_v62 = vsel %vm733_vm2, %v1106_v58, -inf }
 0x3a3   : > { %1112 = vmax.xlane.f32.xlu0 %v1111_v62 }
 0x418   : > { %v782_v63 = vpop.xlane.xlu1 %781 }
 0x419   : > { %v783_v0 = vsub.f32 %v775_v40, %v782_v63 }
 0x41b   : > { %v784_v1 = vmul.f32 1.442695, %v783_v0 }
 0x41d   : > { %2915 = vpow2.f32 %v784_v1 }
 0x420   : > { %v893_v2 = vpop.xlane.xlu0 %892 }
 0x421   : > { %v894_v3 = vsub.f32 %v886_v46, %v893_v2 }
 0x423   : > { %v895_v4 = vmul.f32 1.442695, %v894_v3 }
 0x425   : > { %2917 = vpow2.f32 %v895_v4 }
 0x427   : > { %v2916_v5 = vpop.eup %2915 }
 0x428   : > { %v786_v6 = vsel %vm733_vm2, %v2916_v5, 0.0  ;;  %v1003_v15 = vpop.xlane.xlu1 %1002 }
 0x429   : > { %787 = vadd.xlane.f32.xlu1 %v786_v6  ;;  %v1004_v16 = vsub.f32 %v996_v52, %v1003_v15 }
 0x42b   : > { %v1005_v17 = vmul.f32 1.442695, %v1004_v16 }
 0x42f   : > { %v2918_v7 = vpop.eup %2917 }
 0x430   : > { %v1113_v9 = vpop.xlane.xlu0 %1112  ;;  %v897_v10 = vsel %vm733_vm2, %v2918_v7, 0.0 }
 0x431   : > { %v1114_v11 = vsub.f32 %v1106_v58, %v1113_v9  ;;  %898 = vadd.xlane.f32.xlu0 %v897_v10 }
 0x433   : > { %v1115_v12 = vmul.f32 1.442695, %v1114_v11 }
 0x435   : > { %2919 = vpow2.f32 %v1115_v12 }
 0x436   : > { %2921 = vpow2.f32 %v1005_v17 }
 0x43a   : > { %792 = vrot.lane.b32.xlu1 %v3263_v25, %s3701_s27  ;;  %s3728_s27 = smov 120  }
 0x43f   : > { %v2920_v13 = vpop.eup %2919 }
 0x440   : > { %v1117_v14 = vsel %vm733_vm2, %v2920_v13, 0.0  ;;  %v2922_v19 = vpop.eup %2921 }
 0x441   : > { %1118 = vadd.xlane.f32.xlu0 %v1117_v14  ;;  %v1007_v20 = vsel %vm733_vm2, %v2922_v19, 0.0 }
 0x457   : > { %903 = vrot.lane.b32.xlu0 %v3263_v25, %s3700_s23  ;;  %s3730_s23 = smov 112  }
 0x45e   : > { %1008 = vadd.xlane.f32.xlu1 %v1007_v20 }
 0x46f   : > { %1013 = vrot.lane.b32.xlu1 %v3263_v25, %s3699_s24  ;;  %s3703_s24 = smov 24  }
 0x473   : > { %1123 = vrot.lane.b32.xlu1 %v3263_v25, %s3698_s28  ;;  %s3727_s28 = smov 96  }
 0x4b6   : > { %v788_v21 = vpop.xlane.xlu1 %787 }
 0x4b7   : > { %2923 = vrcp.f32 %v788_v21 }
 0x4ba   : > { %v793_v22 = vpop.permute.xlu1 %792 }
 0x4bb   : > { %v799_v23 = vsel %vm797_vm3, %v793_v22, 0  ;;  %v2895_v22 = vld [vmem:[%s3682_s10] sm:$0xff]  }
 0x4bc   : > { %2670 = vmatpush3.bf16.msra.mxu0 %v799_v23  ;;  %v2896_v23 = vld [vmem:[%s3682_s10 + $0x8] sm:$0xff]  }
 0x4bd   : > { %2681 = vmatprep.subr.bf16.mxu0 %v3057_v8 }
 0x4be   : > { %v899_v26 = vpop.xlane.xlu0 %898 }
 0x4bf   : > { %2925 = vrcp.f32 %v899_v26 }
 0x4c1   : > { %v2924_v24 = vpop.eup %2923 }
 0x4c2   : > { %v790_v27 = vmul.f32 %v2924_v24, %v2916_v5 }
 0x4c4   : > { %v791_v28 = vpack.c.bf16 %v790_v27, %v790_v27 }
 0x4c6   : > { %2672 = vmatmul.mubr.msk.bf16.vlgmr.msra.gmra.mrb[4].mxu0 %vm733_vm2, %v791_v28  ;;  %v2512_v28 = vld [vmem:[%s3680_s8] ss:$0 sm:$0xff] }
 0x4c7   : > { %2683 = vmatprep.mubr.msk.bf16.mxu0 %vm3058_vm1, %v3057_v8 }
 0x4c9   : > { %v2926_v25 = vpop.eup %2925 }
 0x4ca   : > { %v901_v30 = vmul.f32 %v2926_v25, %v2918_v7  ;;  %v2508_v7 = vld [vmem:[%s3679_s7] ss:$0 sm:$0xff] }
 0x4cc   : > { %v902_v33 = vpack.c.bf16 %v901_v30, %v901_v30 }
 0x4ce   : > { %v1119_v29 = vpop.xlane.xlu0 %1118 }
 0x4d2   : > { %v904_v31 = vpop.permute.xlu0 %903 }
 0x4d3   : > { %v909_v32 = vsel %vm797_vm3, %v904_v31, 0 }
 0x4d4   : > { %2682 = vmatpush3.bf16.msra.mxu0 %v909_v32 }
 0x4d5   : > { %2693 = vmatprep.subr.bf16.mxu0 %v3057_v8 }
 0x4d7   : > { %2684 = vmatmul.mubr.msk.bf16.vlgmr.msra.gmra.mrb[8].mxu0 %vm733_vm2, %v902_v33  ;;  %v2897_v33 = vld [vmem:[%s3684_s12] sm:$0xff]  }
 0x4d8   : > { %2695 = vmatprep.mubr.msk.bf16.mxu0 %vm3058_vm1, %v3057_v8 }
 0x4eb   : > { %v1009_v34 = vpop.xlane.xlu1 %1008 }
 0x4ec   : > { %2927 = vrcp.f32 %v1009_v34  ;;  %v2898_v34 = vld [vmem:[%s3684_s12 + $0x8] sm:$0xff]  }
 0x4ed   : > { %2929 = vrcp.f32 %v1119_v29  ;;  %v2513_v29 = vld [vmem:[%s3681_s9] ss:$0 sm:$0xff] }
 0x4ef   : > { %v1014_v35 = vpop.permute.xlu1 %1013 }
 0x4f0   : > { %v1019_v36 = vsel %vm797_vm3, %v1014_v35, 0  ;;  %v2899_v35 = vld [vmem:[%s3684_s12 + $0x10] sm:$0xff]  }
 0x4f1   : > { %2694 = vmatpush3.bf16.msra.mxu0 %v1019_v36  ;;  %v2900_v36 = vld [vmem:[%s3684_s12 + $0x18] sm:$0xff]  }
 0x4f2   : > { %2705 = vmatprep.subr.bf16.mxu0 %v3057_v8 }
 0x4f3   : > { %v1124_v40 = vpop.permute.xlu1 %1123 }
 0x4f4   : > { %v1129_v43 = vsel %vm797_vm3, %v1124_v40, 0 }
 0x4f6   : > { %v2928_v37 = vpop.eup %2927 }
 0x4f7   : > { %v1011_v39 = vmul.f32 %v2928_v37, %v2922_v19  ;;  %v2930_v42 = vpop.eup %2929  ;;  %v2514_v37 = vld [vmem:[%s3683_s11] ss:$0 sm:$0xff] }
 0x4f8   : > { %v1121_v44 = vmul.f32 %v2930_v42, %v2920_v13 }
 0x4f9   : > { %v1012_v41 = vpack.c.bf16 %v1011_v39, %v1011_v39 }
 0x4fa   : > { %v1122_v45 = vpack.c.bf16 %v1121_v44, %v1121_v44 }
 0x4fb   : > { %2696 = vmatmul.mubr.msk.bf16.vlgmr.msra.gmra.mrb[12].mxu0 %vm733_vm2, %v1012_v41 }
 0x4fc   : > { %2706 = vmatpush3.bf16.msra.mxu0 %v1129_v43  ;;  %2707 = vmatprep.mubr.msk.bf16.mxu0 %vm3058_vm1, %v3057_v8 }
 0x4fd   : > { %2719 = vmatprep.subr.bf16.mxu0 %v3057_v8 }
 0x503   : > { %2708 = vmatmul.mubr.msk.bf16.vlgmr.msra.gmra.mrb[16].mxu0 %vm733_vm2, %v1122_v45 }
 0x504   : > { %2723 = vmatprep.mubr.msk.bf16.mxu0 %vm3058_vm1, %v3057_v8  ;;  %2720 = vmatpush3.bf16.msra.mxu0 %v2895_v22 }
 0x505   : > { %2721 = vmatprep.subr.bf16.mxu0 %v3057_v8 }
 0x508   : > { %2722 = vmatpush3.bf16.msra.mxu0 %v2896_v23 }
 0x509   : > { %2739 = vmatprep.subr.bf16.mxu0 %v3057_v8 }
 0x599   : > { %v835_v46 = vpop.f32.mrb[4].mxu0 }
 0x59a   : > { %v2673_v47 = vpop.f32.mrb[5].mxu0 }
 0x59b   : > { %v838_v48 = vpop.f32.mrb[6].mxu0 }
 0x59c   : > { %v2674_v49 = vpop.f32.mrb[7].mxu0 }
 0x5aa   : > { %v945_v50 = vpop.f32.mrb[8].mxu0 }
 0x5ab   : > { %1172 = vrot.lane.b32.xlu0 %v945_v50, %s3705_s29  ;;  %v2685_v51 = vpop.f32.mrb[9].mxu0  ;;  %s3735_s29 = smov 48  }
 0x5ac   : > { %v948_v52 = vpop.f32.mrb[10].mxu0 }
 0x5ad   : > { %v2686_v53 = vpop.f32.mrb[11].mxu0 }
 0x5ce   : > { %v1055_v56 = vpop.f32.mrb[12].mxu0 }
 0x5cf   : > { %1176 = vrot.lane.b32.xlu1 %v1055_v56, %s3704_s2  ;;  %v2697_v57 = vpop.f32.mrb[13].mxu0  ;;  %s3734_s2 = smov 56  }
 0x5d0   : > { %v1058_v58 = vpop.f32.mrb[14].mxu0 }
 0x5d1   : > { %v2698_v59 = vpop.f32.mrb[15].mxu0 }
 0x5d6   : > { %v1165_v60 = vpop.f32.mrb[16].mxu0 }
 0x5d7   : > { %1180 = vrot.lane.b32.xlu0 %v1165_v60, %s3703_s24  ;;  %v2709_v61 = vpop.f32.mrb[17].mxu0  ;;  %s3729_s24 = smov 80  }
 0x5d8   : > { %v1168_v62 = vpop.f32.mrb[18].mxu0 }
 0x5d9   : > { %v2710_v63 = vpop.f32.mrb[19].mxu0 }
 0x61d   : > { %v1173_v0 = vpop.permute.xlu0 %1172 }
 0x61e   : > { %v1183_v2 = vsel %vm733_vm2, %v835_v46, %v1173_v0 }
 0x641   : > { %v1177_v1 = vpop.permute.xlu1 %1176 }
 0x642   : > { %v1185_v3 = vsel %vm1184_vm4, %v1183_v2, %v1177_v1 }
 0x649   : > { %v1181_v4 = vpop.permute.xlu0 %1180 }
 0x64a   : > { %v1187_v5 = vsel %vm1186_vm5, %v1185_v3, %v1181_v4  ;;  %v2901_v3 = vld [vmem:[%s3721_s4 + $0x10] sm:$0xff]   ;;  %v2902_v4 = vld [vmem:[%s3721_s4 + $0x18] sm:$0xff]  }
 0x64b   : > { %v1188_v6 = vpack.c.bf16 %v1187_v5, %v1187_v5 }
 0x64d   : > { %2716 = vmatmul.mubr.msk.bf16.vlgmr.msra.gmra.mrb[16].mxu1 %vm626_vm0, %v1188_v6 }
 0x64e   : > { %2735 = vmatprep.mubr.msk.bf16.mxu1 %vm3058_vm1, %v3057_v8  ;;  %2728 = vmatpush3.bf16.msra.mxu1 %v2897_v33 }
 0x64f   : > { %2729 = vmatprep.subr.bf16.mxu1 %v3057_v8 }
 0x652   : > { %2730 = vmatpush3.bf16.msra.mxu1 %v2898_v34 }
 0x653   : > { %2731 = vmatprep.subr.bf16.mxu1 %v3057_v8 }
 0x656   : > { %2732 = vmatpush3.bf16.msra.mxu1 %v2899_v35 }
 0x657   : > { %2733 = vmatprep.subr.bf16.mxu1 %v3057_v8 }
 0x65a   : > { %2734 = vmatpush3.bf16.msra.mxu1 %v2900_v36 }
 0x65b   : > { %2753 = vmatprep.subr.bf16.mxu1 %v3057_v8 }
 0x720   : > { %v1249_v9 = vpop.f32.mrb[16].mxu1 }
 0x721   : > { %v1250_v10 = vadd.f32 %v2508_v7, %v1249_v9  ;;  %v2717_v11 = vpop.f32.mrb[17].mxu1 }
 0x722   : > { %v1252_v12 = vpop.f32.mrb[18].mxu1 }
 0x723   : > { %v2718_v13 = vpop.f32.mrb[19].mxu1  ;;  %v1255_v14 = vadd.f32 %v1250_v10, %v3253_v18  ;;  %v2524_v10 = vld [vmem:[%s3686_s14] ss:$0 sm:$0xff] }
 0x724   : > { %v2525_v12 = vld [vmem:[%s3687_s15] ss:$0 sm:$0xff] }
 0x725   : > { %v1258_v15 = vsel %vm626_vm0, %v1255_v14, 0.0 }
 0x726   : > { %1259 = vadd.xlane.f32.xlu1 %v1258_v15 }
 0x7b3   : > { %v1260_v16 = vpop.xlane.xlu1 %1259 }
 0x7b4   : > { %v1261_v17 = vmul.f32 0.03125, %v1260_v16  ;;  %v2531_v16 = vld [vmem:[%s3724_s5 + $0x1] ss:$0 sm:$0xff]  ;;  %s3073_s5 = smov [#allocation2]  }
 0x7b6   : > { %v1262_v19 = vsub.f32 %v1255_v14, %v1261_v17 }
 0x7b8   : > { %v1263_v20 = vmul.f32 %v1262_v19, %v1262_v19 }
 0x7ba   : > { %v1264_v21 = vsel %vm626_vm0, %v1263_v20, 0.0 }
 0x7bb   : > { %1265 = vadd.xlane.f32.xlu0 %v1264_v21 }
 0x848   : > { %v1266_v18 = vpop.xlane.xlu0 %1265 }
 0x849   : > { %v1267_v24 = vmul.f32 0.03125, %v1266_v18 }
 0x84b   : > { %v1268_v26 = vadd.f32 1e-05, %v1267_v24 }
 0x84d   : > { %2931 = vrsqrt.f32 %v1268_v26 }
 0x857   : > { %v2932_v27 = vpop.eup %2931 }
 0x858   : > { %v1270_v25 = vmul.f32 %v2932_v27, %v1262_v19 }
 0x85a   : > { %v1277_v30 = vmul.f32 %v2512_v28, %v1270_v25 }
 0x85c   : > { %v1284_v31 = vadd.f32 %v2513_v29, %v1277_v30 }
 0x85e   : > { %v1285_v32 = vpack.c.bf16 %v1284_v31, %v1284_v31 }
 0x860   : > { %2724 = vmatmul.mubr.msk.bf16.vlgmr.msra.gmra.mrb[20].mxu0 %vm626_vm0, %v1285_v32 }
 0x861   : > { %2743 = vmatprep.mubr.msk.bf16.mxu0 %vm3058_vm1, %v3057_v8  ;;  %2740 = vmatpush3.bf16.msra.mxu0 %v2901_v3 }
 0x862   : > { %2741 = vmatprep.subr.bf16.mxu0 %v3057_v8 }
 0x865   : > { %2742 = vmatpush3.bf16.msra.mxu0 %v2902_v4 }
 0x866   : > { %2747 = vmatprep.subr.bf16.mxu0 %v3057_v8 }
 0x933   : > { %v1346_v39 = vpop.f32.mrb[20].mxu0 }
 0x934   : > { %v1347_v40 = vadd.f32 %v2514_v37, %v1346_v39  ;;  %v2725_v41 = vpop.f32.mrb[21].mxu0 }
 0x935   : > { %v1349_v42 = vpop.f32.mrb[22].mxu0 }
 0x936   : > { %v1353_v43 = vmul.f32 0.044715, %v1347_v40  ;;  %v2726_v44 = vpop.f32.mrb[23].mxu0  ;;  %v1352_v50 = vmul.f32 0.5, %v1347_v40 }
 0x938   : > { %v1354_v45 = vmul.f32 %v1353_v43, %v1347_v40 }
 0x93a   : > { %v1355_v46 = vmul.f32 %v1354_v45, %v1347_v40 }
 0x93c   : > { %v1356_v47 = vadd.f32 %v1355_v46, %v1347_v40 }
 0x93e   : > { %v1357_v48 = vmul.f32 0.7978846, %v1356_v47 }
 0x940   : > { %2933 = vtanh.f32 %v1357_v48 }
 0x94a   : > { %v2934_v49 = vpop.eup %2933 }
 0x94b   : > { %v1359_v51 = vadd.f32 1.0, %v2934_v49 }
 0x94d   : > { %v1360_v52 = vmul.f32 %v1359_v51, %v1352_v50 }
 0x94f   : > { %v1361_v53 = vpack.c.bf16 %v1360_v52, %v1360_v52 }
 0x951   : > { %2736 = vmatmul.mubr.msk.bf16.vlgmr.msra.gmra.mrb[20].mxu1 %vm1401_vm6, %v1361_v53 }
 0x952   : > { %2755 = vmatprep.mubr.msk.bf16.mxu1 %vm3058_vm1, %v3057_v8 }
 0xa24   : > { %v1439_v55 = vpop.f32.mrb[20].mxu1 }
 0xa25   : > { %v1440_v56 = vadd.f32 %v2518_v54, %v1439_v55  ;;  %v2737_v57 = vpop.f32.mrb[21].mxu1 }
 0xa26   : > { %v1442_v58 = vpop.f32.mrb[22].mxu1 }
 0xa27   : > { %v2738_v59 = vpop.f32.mrb[23].mxu1  ;;  %v1445_v60 = vadd.f32 %v1440_v56, %v1284_v31 }
 0xa29   : > { %v1448_v61 = vsel %vm626_vm0, %v1445_v60, 0.0 }
 0xa2a   : > { %1449 = vadd.xlane.f32.xlu0 %v1448_v61 }
 0xab7   : > { %v1450_v62 = vpop.xlane.xlu0 %1449 }
 0xab8   : > { %v1451_v63 = vmul.f32 0.03125, %v1450_v62 }
 0xaba   : > { %v1452_v0 = vsub.f32 %v1445_v60, %v1451_v63 }
 0xabc   : > { %v1453_v1 = vmul.f32 %v1452_v0, %v1452_v0 }
 0xabe   : > { %v1454_v2 = vsel %vm626_vm0, %v1453_v1, 0.0 }
 0xabf   : > { %1455 = vadd.xlane.f32.xlu1 %v1454_v2 }
 0xb4c   : > { %v1456_v5 = vpop.xlane.xlu1 %1455 }
 0xb4d   : > { %v1457_v6 = vmul.f32 0.03125, %v1456_v5 }
 0xb4f   : > { %v1458_v7 = vadd.f32 1e-05, %v1457_v6 }
 0xb51   : > { %2935 = vrsqrt.f32 %v1458_v7 }
 0xb5b   : > { %v2936_v9 = vpop.eup %2935 }
 0xb5c   : > { %v1460_v11 = vmul.f32 %v2936_v9, %v1452_v0 }
 0xb5e   : > { %v1467_v13 = vmul.f32 %v2524_v10, %v1460_v11 }
 0xb60   : > { %v3427_v14 = vadd.f32 %v2525_v12, %v1467_v13 }
 0xb62   : > { %v1475_v15 = vpack.c.bf16 %v3427_v14, %v3427_v14 }
 0xb64   : > { %2744 = vmatmul.mubr.msk.bf16.vlgmr.msra.gmra.mrb[24].mxu0 %vm626_vm0, %v1475_v15 }
 0xb65   : > { %2749 = vmatprep.mubr.msk.bf16.mxu0 %vm3058_vm1, %v3057_v8 }
 0xc37   : > { %v1538_v17 = vpop.f32.mrb[24].mxu0 }
 0xc38   : > { %v1539_v19 = vadd.f32 %v2531_v16, %v1538_v17  ;;  %v2745_v20 = vpop.f32.mrb[25].mxu0 }
 0xc39   : > { %v1541_v21 = vpop.f32.mrb[26].mxu0 }
 0xc3a   : > { %v3437_v22 = vpack.c.bf16 %v1539_v19, %v1539_v19  ;;  %v2746_v23 = vpop.f32.mrb[27].mxu0 }
 0xc3c   : > { %1656 = vrot.lane.b32.xlu1 %v3437_v22, %s3061_s22  ;;  %1546 = vrot.lane.b32.xlu0 %v3437_v22, %s3727_s28  ;;  %s3733_s22 = smov 64   ;;  %s3736_s28 = smov 40  }
 0xc40   : > { %1654 = vrot.lane.b32.xlu1 %v3437_v22, %s3728_s27  ;;  %1766 = vrot.lane.b32.xlu0 %v3437_v22, %s3729_s24  ;;  %s3737_s27 = smov 8  }
 0xc44   : > { %1764 = vrot.lane.b32.xlu1 %v3437_v22, %s3730_s23  ;;  %1876 = vrot.lane.b32.xlu0 %v3437_v22, %s3731_s20 }
 0xc48   : > { %1874 = vrot.lane.b32.xlu1 %v3437_v22, %s3732_s25  ;;  %s2588_s25 = sshll.u32 %s3196_s1, 7 }
 0xcae   : > { %v1547_v18 = vpop.permute.xlu0 %1546  ;;  %v1657_v26 = vpop.permute.xlu1 %1656 }
 0xcaf   : > { %v1552_v24 = vsel %vm733_vm2, %v1547_v18, 0  ;;  %v1662_v27 = vsel %vm733_vm2, %v1657_v26, 0 }
 0xcb0   : > { %2748 = vmatpush3.bf16.xpose.msra.mxu0 %v1552_v24 }
 0xcb1   : > { %2759 = vmatprep.subr.bf16.mxu0 %v3057_v8 }
 0xcb2   : > { %v1767_v28 = vpop.permute.xlu0 %1766  ;;  %v1655_v25 = vpop.permute.xlu1 %1654 }
 0xcb3   : > { %v1772_v29 = vsel %vm733_vm2, %v1767_v28, 0 }
 0xcb6   : > { %v1877_v30 = vpop.permute.xlu0 %1876  ;;  %v1765_v31 = vpop.permute.xlu1 %1764 }
 0xcb7   : > { %2750 = vmatmul.mubr.msk.bf16.vlgmr.msra.gmra.mrb[28].mxu0 %vm733_vm2, %v3437_v22  ;;  %v1882_v32 = vsel %vm733_vm2, %v1877_v30, 0 }
 0xcb8   : > { %2760 = vmatpush3.bf16.xpose.msra.mxu0 %v1662_v27  ;;  %2761 = vmatprep.mubr.msk.bf16.mxu0 %vm3058_vm1, %v3057_v8 }
 0xcb9   : > { %2771 = vmatprep.subr.bf16.mxu0 %v3057_v8 }
 0xcba   : > { %v1875_v33 = vpop.permute.xlu1 %1874 }
 0xcbf   : > { %2762 = vmatmul.mubr.msk.bf16.vlgmr.msra.gmra.mrb[32].mxu0 %vm733_vm2, %v1655_v25 }
 0xcc0   : > { %2772 = vmatpush3.bf16.xpose.msra.mxu0 %v1772_v29  ;;  %2773 = vmatprep.mubr.msk.bf16.mxu0 %vm3058_vm1, %v3057_v8 }
 0xcc1   : > { %2783 = vmatprep.subr.bf16.mxu0 %v3057_v8 }
 0xcc7   : > { %2774 = vmatmul.mubr.msk.bf16.vlgmr.msra.gmra.mrb[36].mxu0 %vm733_vm2, %v1765_v31 }
 0xcc8   : > { %2784 = vmatpush3.bf16.xpose.msra.mxu0 %v1882_v32  ;;  %2785 = vmatprep.mubr.msk.bf16.mxu0 %vm3058_vm1, %v3057_v8 }
 0xcc9   : > { %2795 = vmatprep.subr.bf16.mxu0 %v3057_v8 }
 0xccf   : > { %2786 = vmatmul.mubr.msk.bf16.vlgmr.msra.gmra.mrb[40].mxu0 %vm733_vm2, %v1875_v33 }
 0xcd0   : > { %2799 = vmatprep.mubr.msk.bf16.mxu0 %vm3058_vm1, %v3057_v8 }
 0xd8a   : > { %v1588_v34 = vpop.f32.mrb[28].mxu0 }
 0xd8b   : > { %v1589_v35 = vadd.f32 %v3304_v38, %v1588_v34  ;;  %v2751_v36 = vpop.f32.mrb[29].mxu0 }
 0xd8c   : > { %v1591_v37 = vpop.f32.mrb[30].mxu0 }
 0xd8d   : > { %v2752_v39 = vpop.f32.mrb[31].mxu0  ;;  %v1594_v40 = vsel %vm733_vm2, %v1589_v35, -inf }
 0xd8e   : > { %1595 = vmax.xlane.f32.xlu0 %v1594_v40 }
 0xd92   : > { %v1698_v41 = vpop.f32.mrb[32].mxu0 }
 0xd93   : > { %v1699_v42 = vadd.f32 %v3304_v38, %v1698_v41  ;;  %v2763_v43 = vpop.f32.mrb[33].mxu0 }
 0xd94   : > { %v1701_v44 = vpop.f32.mrb[34].mxu0 }
 0xd95   : > { %v2764_v45 = vpop.f32.mrb[35].mxu0  ;;  %v1704_v46 = vsel %vm733_vm2, %v1699_v42, -inf }
 0xd96   : > { %1705 = vmax.xlane.f32.xlu1 %v1704_v46 }
 0xd9a   : > { %v1808_v47 = vpop.f32.mrb[36].mxu0 }
 0xd9b   : > { %v1809_v48 = vadd.f32 %v3304_v38, %v1808_v47  ;;  %v2775_v49 = vpop.f32.mrb[37].mxu0 }
 0xd9c   : > { %v1811_v50 = vpop.f32.mrb[38].mxu0  ;;  %v2903_v49 = vld [vmem:[%s3726_s6 + $0x10] sm:$0xff]  }
 0xd9d   : > { %v2776_v51 = vpop.f32.mrb[39].mxu0  ;;  %v1814_v52 = vsel %vm733_vm2, %v1809_v48, -inf  ;;  %2796 = vmatpush3.bf16.msra.mxu0 %v2903_v49  ;;  %v2904_v50 = vld [vmem:[%s3726_s6 + $0x18] sm:$0xff]   ;;  %s2965_s6 = sshll.u32 %s3073_s5, 4  ;;  %s2966_s6 = int_to_ptr.vmem [resolvable:$false] %s2965_s6 }
 0xd9e   : > { %1815 = vmax.xlane.f32.xlu0 %v1814_v52  ;;  %2797 = vmatprep.subr.bf16.mxu0 %v3057_v8 }
 0xda1   : > { %2798 = vmatpush3.bf16.msra.mxu0 %v2904_v50 }
 0xda2   : > { %v1918_v53 = vpop.f32.mrb[40].mxu0  ;;  %2811 = vmatprep.subr.bf16.mxu0 %v3057_v8 }
 0xda3   : > { %v1919_v54 = vadd.f32 %v3304_v38, %v1918_v53  ;;  %v2787_v55 = vpop.f32.mrb[41].mxu0 }
 0xda4   : > { %v1921_v56 = vpop.f32.mrb[42].mxu0 }
 0xda5   : > { %v2788_v57 = vpop.f32.mrb[43].mxu0  ;;  %v1924_v58 = vsel %vm733_vm2, %v1919_v54, -inf }
 0xda6   : > { %1925 = vmax.xlane.f32.xlu0 %v1924_v58 }
 0xe1b   : > { %v1596_v59 = vpop.xlane.xlu0 %1595 }
 0xe1c   : > { %v1597_v60 = vsub.f32 %v1589_v35, %v1596_v59 }
 0xe1e   : > { %v1598_v61 = vmul.f32 1.442695, %v1597_v60 }
 0xe20   : > { %2937 = vpow2.f32 %v1598_v61 }
 0xe23   : > { %v1706_v62 = vpop.xlane.xlu1 %1705 }
 0xe24   : > { %v1707_v63 = vsub.f32 %v1699_v42, %v1706_v62 }
 0xe26   : > { %v1708_v0 = vmul.f32 1.442695, %v1707_v63 }
 0xe28   : > { %2939 = vpow2.f32 %v1708_v0 }
 0xe2a   : > { %v2938_v1 = vpop.eup %2937 }
 0xe2b   : > { %v1600_v2 = vsel %vm733_vm2, %v2938_v1, 0.0  ;;  %v1816_v3 = vpop.xlane.xlu0 %1815 }
 0xe2c   : > { %1601 = vadd.xlane.f32.xlu1 %v1600_v2  ;;  %v1817_v11 = vsub.f32 %v1809_v48, %v1816_v3  ;;  %v2548_v2 = vld [vmem:[%s3679_s7 + $0x1] ss:$0 sm:$0xff] }
 0xe2e   : > { %v1818_v12 = vmul.f32 1.442695, %v1817_v11 }
 0xe32   : > { %v2940_v38 = vpop.eup %2939 }
 0xe33   : > { %v1926_v4 = vpop.xlane.xlu0 %1925  ;;  %v1710_v5 = vsel %vm733_vm2, %v2940_v38, 0.0 }
 0xe34   : > { %v1927_v6 = vsub.f32 %v1919_v54, %v1926_v4  ;;  %1711 = vadd.xlane.f32.xlu0 %v1710_v5 }
 0xe36   : > { %v1928_v7 = vmul.f32 1.442695, %v1927_v6 }
 0xe38   : > { %2941 = vpow2.f32 %v1928_v7 }
 0xe39   : > { %2943 = vpow2.f32 %v1818_v12 }
 0xe3d   : > { %1606 = vrot.lane.b32.xlu1 %v3437_v22, %s3733_s22  ;;  %s3738_s22 = smov 16  }
 0xe42   : > { %v2942_v9 = vpop.eup %2941 }
 0xe43   : > { %v1930_v10 = vsel %vm733_vm2, %v2942_v9, 0.0  ;;  %v2944_v13 = vpop.eup %2943 }
 0xe44   : > { %1931 = vadd.xlane.f32.xlu0 %v1930_v10  ;;  %v1820_v15 = vsel %vm733_vm2, %v2944_v13, 0.0 }
 0xe5a   : > { %1716 = vrot.lane.b32.xlu0 %v3437_v22, %s3734_s2  ;;  %s3739_s2 = smov 24  }
 0xe61   : > { %1821 = vadd.xlane.f32.xlu1 %v1820_v15 }
 0xe72   : > { %1826 = vrot.lane.b32.xlu1 %v3437_v22, %s3735_s29 }
 0xe76   : > { %1936 = vrot.lane.b32.xlu1 %v3437_v22, %s3736_s28  ;;  %s3601_s28 = scalar_lea.hbm %s3690_s18, %s2588_s25 }
 0xeb9   : > { %v1602_v16 = vpop.xlane.xlu1 %1601 }
 0xeba   : > { %2945 = vrcp.f32 %v1602_v16  ;;  %v2905_v16 = vld [vmem:[%s3682_s10 + $0x10] sm:$0xff]  }
 0xebd   : > { %v1607_v17 = vpop.permute.xlu1 %1606 }
 0xebe   : > { %v1612_v19 = vsel %vm797_vm3, %v1607_v17, 0  ;;  %v2906_v17 = vld [vmem:[%s3682_s10 + $0x18] sm:$0xff]  }
 0xebf   : > { %2754 = vmatpush3.bf16.msra.mxu1 %v1612_v19 }
 0xec0   : > { %2765 = vmatprep.subr.bf16.mxu1 %v3057_v8 }
 0xec1   : > { %v1712_v21 = vpop.xlane.xlu0 %1711 }
 0xec2   : > { %2947 = vrcp.f32 %v1712_v21 }
 0xec4   : > { %v2946_v20 = vpop.eup %2945 }
 0xec5   : > { %v1604_v23 = vmul.f32 %v2946_v20, %v2938_v1 }
 0xec7   : > { %v1605_v18 = vpack.c.bf16 %v1604_v23, %v1604_v23  ;;  %v2554_v23 = vld [vmem:[%s3680_s8 + $0x1] ss:$0 sm:$0xff] }
 0xec9   : > { %2756 = vmatmul.mubr.msk.bf16.vlgmr.msra.gmra.mrb[24].mxu1 %vm733_vm2, %v1605_v18 }
 0xeca   : > { %2767 = vmatprep.mubr.msk.bf16.mxu1 %vm3058_vm1, %v3057_v8 }
 0xecc   : > { %v2948_v24 = vpop.eup %2947 }
 0xecd   : > { %v1714_v26 = vmul.f32 %v2948_v24, %v2940_v38  ;;  %v2555_v24 = vld [vmem:[%s3681_s9 + $0x1] ss:$0 sm:$0xff] }
 0xecf   : > { %v1715_v25 = vpack.c.bf16 %v1714_v26, %v1714_v26 }
 0xed1   : > { %v1932_v22 = vpop.xlane.xlu0 %1931 }
 0xed5   : > { %v1717_v27 = vpop.permute.xlu0 %1716 }
 0xed6   : > { %v1722_v28 = vsel %vm797_vm3, %v1717_v27, 0 }
 0xed7   : > { %2766 = vmatpush3.bf16.msra.mxu1 %v1722_v28  ;;  %v2907_v28 = vld [vmem:[%s3684_s12 + $0x20] sm:$0xff]  }
 0xed8   : > { %2777 = vmatprep.subr.bf16.mxu1 %v3057_v8 }
 0xeda   : > { %2768 = vmatmul.mubr.msk.bf16.vlgmr.msra.gmra.mrb[28].mxu1 %vm733_vm2, %v1715_v25  ;;  %v2908_v25 = vld [vmem:[%s3684_s12 + $0x28] sm:$0xff]  }
 0xedb   : > { %2779 = vmatprep.mubr.msk.bf16.mxu1 %vm3058_vm1, %v3057_v8 }
 0xeee   : > { %v1822_v29 = vpop.xlane.xlu1 %1821 }
 0xeef   : > { %2949 = vrcp.f32 %v1822_v29  ;;  %v2909_v29 = vld [vmem:[%s3684_s12 + $0x30] sm:$0xff]  }
 0xef0   : > { %2951 = vrcp.f32 %v1932_v22 }
 0xef2   : > { %v1827_v30 = vpop.permute.xlu1 %1826 }
 0xef3   : > { %v1832_v31 = vsel %vm797_vm3, %v1827_v30, 0  ;;  %v2910_v30 = vld [vmem:[%s3684_s12 + $0x38] sm:$0xff]  }
 0xef4   : > { %2778 = vmatpush3.bf16.msra.mxu1 %v1832_v31  ;;  %v2561_v31 = vld [vmem:[%s3683_s11 + $0x1] ss:$0 sm:$0xff] }
 0xef5   : > { %2789 = vmatprep.subr.bf16.mxu1 %v3057_v8 }
 0xef6   : > { %v1937_v34 = vpop.permute.xlu1 %1936 }
 0xef7   : > { %v1942_v37 = vsel %vm797_vm3, %v1937_v34, 0 }
 0xef9   : > { %v2950_v32 = vpop.eup %2949 }
 0xefa   : > { %v1824_v33 = vmul.f32 %v2950_v32, %v2944_v13  ;;  %v2952_v36 = vpop.eup %2951 }
 0xefb   : > { %v1934_v39 = vmul.f32 %v2952_v36, %v2942_v9 }
 0xefc   : > { %v1825_v35 = vpack.c.bf16 %v1824_v33, %v1824_v33 }
 0xefd   : > { %v1935_v40 = vpack.c.bf16 %v1934_v39, %v1934_v39 }
 0xefe   : > { %2780 = vmatmul.mubr.msk.bf16.vlgmr.msra.gmra.mrb[32].mxu1 %vm733_vm2, %v1825_v35 }
 0xeff   : > { %2790 = vmatpush3.bf16.msra.mxu1 %v1942_v37  ;;  %2791 = vmatprep.mubr.msk.bf16.mxu1 %vm3058_vm1, %v3057_v8 }
 0xf00   : > { %2803 = vmatprep.subr.bf16.mxu1 %v3057_v8 }
 0xf06   : > { %2792 = vmatmul.mubr.msk.bf16.vlgmr.msra.gmra.mrb[36].mxu1 %vm733_vm2, %v1935_v40 }
 0xf07   : > { %2807 = vmatprep.mubr.msk.bf16.mxu1 %vm3058_vm1, %v3057_v8  ;;  %2804 = vmatpush3.bf16.msra.mxu1 %v2905_v16 }
 0xf08   : > { %2805 = vmatprep.subr.bf16.mxu1 %v3057_v8 }
 0xf0b   : > { %2806 = vmatpush3.bf16.msra.mxu1 %v2906_v17 }
 0xf0c   : > { %2823 = vmatprep.subr.bf16.mxu1 %v3057_v8 }
 0xf9c   : > { %v1648_v41 = vpop.f32.mrb[24].mxu1 }
 0xf9d   : > { %v2757_v42 = vpop.f32.mrb[25].mxu1 }
 0xf9e   : > { %v1651_v43 = vpop.f32.mrb[26].mxu1 }
 0xf9f   : > { %v2758_v44 = vpop.f32.mrb[27].mxu1 }
 0xfad   : > { %v1758_v45 = vpop.f32.mrb[28].mxu1 }
 0xfae   : > { %1985 = vrot.lane.b32.xlu0 %v1758_v45, %s3737_s27  ;;  %v2769_v46 = vpop.f32.mrb[29].mxu1 }
 0xfaf   : > { %v1761_v47 = vpop.f32.mrb[30].mxu1 }
 0xfb0   : > { %v2770_v48 = vpop.f32.mrb[31].mxu1 }
 0xfb1   : > { %v2574_v48 = vld [vmem:[%s3685_s13 + $0x1] ss:$0 sm:$0xff] }
 0xfd1   : > { %v1868_v51 = vpop.f32.mrb[32].mxu1 }
 0xfd2   : > { %1989 = vrot.lane.b32.xlu1 %v1868_v51, %s3738_s22  ;;  %v2781_v52 = vpop.f32.mrb[33].mxu1 }
 0xfd3   : > { %v1871_v53 = vpop.f32.mrb[34].mxu1 }
 0xfd4   : > { %v2782_v54 = vpop.f32.mrb[35].mxu1 }
 0xfd9   : > { %v1978_v55 = vpop.f32.mrb[36].mxu1 }
 0xfda   : > { %1993 = vrot.lane.b32.xlu0 %v1978_v55, %s3739_s2  ;;  %v2793_v56 = vpop.f32.mrb[37].mxu1  ;;  %s3586_s2 = sand.u32 1, %s3047_s30  }
 0xfdb   : > { %v1981_v57 = vpop.f32.mrb[38].mxu1  ;;  %s2491_s23 = sshll.u32 %s3586_s2, 3  ;;  %s2361_s27 = scalar_lea.sflag [#allocation3], %s3586_s2 }
 0xfdc   : > { %v2794_v58 = vpop.f32.mrb[39].mxu1  ;;  %s608_s20 = scalar_lea.vmem [#allocation2], %s2491_s23  ;;  %s2967_s23 = scalar_lea.vmem %s2966_s6, 256 }
 0xfdd   : > { %s2378_s4 = sshll.u32 %s608_s20, 4  ;;  %s2379_s4 = int_to_ptr.vmem [resolvable:$true] %s2378_s4 }
 0xfde   : > { %s2961_s24 = scalar_lea.vmem %s2379_s4, 128  ;;  %p2968_p0 = scmp.lt.s32.totalorder %s2379_s4, %s2966_s6 }
 0xfdf   : > { %p2962_p11 = scmp.ne.s32.totalorder %s2379_s4, %s2961_s24  ;;  %p2969_p1 = scmp.lt.s32.totalorder %s2967_s23, %s2961_s24 }
 0xfe1   : > { %p2963_p12 = pnand %p2962_p11, %p3213_p5  ;;  %p2970_p2 = por %p2969_p1, %p2968_p0 }
 0xfe3   : > { %p2964_p13 = pneg %p2963_p12 }
 0xfe5   : > { %p2971_p3 = pnand %p2970_p2, %p2964_p13 }
0x1020   : > { %v1986_v59 = vpop.permute.xlu0 %1985 }
0x1021   : > { %v1996_v61 = vsel %vm733_vm2, %v1648_v41, %v1986_v59 }
0x1044   : > { %v1990_v60 = vpop.permute.xlu1 %1989 }
0x1045   : > { %v1997_v62 = vsel %vm1184_vm4, %v1996_v61, %v1990_v60  ;;  %v2911_v61 = vld [vmem:[%s3688_s16] sm:$0xff]  }
0x104c   : > { %v1994_v63 = vpop.permute.xlu0 %1993 }
0x104d   : > { %v1998_v0 = vsel %vm1186_vm5, %v1997_v62, %v1994_v63  ;;  %v2912_v62 = vld [vmem:[%s3688_s16 + $0x8] sm:$0xff]  }
0x104e   : > { %v1999_v1 = vpack.c.bf16 %v1998_v0, %v1998_v0 }
0x1050   : > { %2800 = vmatmul.mubr.msk.bf16.vlgmr.msra.gmra.mrb[44].mxu0 %vm626_vm0, %v1999_v1 }
0x1051   : > { %2819 = vmatprep.mubr.msk.bf16.mxu0 %vm3058_vm1, %v3057_v8  ;;  %2812 = vmatpush3.bf16.msra.mxu0 %v2907_v28 }
0x1052   : > { %2813 = vmatprep.subr.bf16.mxu0 %v3057_v8 }
0x1055   : > { %2814 = vmatpush3.bf16.msra.mxu0 %v2908_v25 }
0x1056   : > { %2815 = vmatprep.subr.bf16.mxu0 %v3057_v8 }
0x1059   : > { %2816 = vmatpush3.bf16.msra.mxu0 %v2909_v29 }
0x105a   : > { %2817 = vmatprep.subr.bf16.mxu0 %v3057_v8 }
0x105d   : > { %2818 = vmatpush3.bf16.msra.mxu0 %v2910_v30 }
0x1123   : > { %v2062_v3 = vpop.f32.mrb[44].mxu0 }
0x1124   : > { %v2063_v38 = vadd.f32 %v2548_v2, %v2062_v3  ;;  %v2801_v4 = vpop.f32.mrb[45].mxu0  ;;  %v2582_v3 = vld [vmem:[%s3686_s14 + $0x1] ss:$0 sm:$0xff] }
0x1125   : > { %v2065_v5 = vpop.f32.mrb[46].mxu0 }
0x1126   : > { %v2802_v6 = vpop.f32.mrb[47].mxu0  ;;  %v2068_v7 = vadd.f32 %v2063_v38, %v3427_v14 }
0x1128   : > { %v2073_v9 = vsel %vm626_vm0, %v2068_v7, 0.0 }
0x1129   : > { %2074 = vadd.xlane.f32.xlu1 %v2073_v9 }
0x11b6   : > { %v2075_v10 = vpop.xlane.xlu1 %2074 }
0x11b7   : > { %v2076_v11 = vmul.f32 0.03125, %v2075_v10 }
0x11b9   : > { %v2077_v12 = vsub.f32 %v2068_v7, %v2076_v11 }
0x11bb   : > { %v2078_v13 = vmul.f32 %v2077_v12, %v2077_v12 }
0x11bd   : > { %v2079_v15 = vsel %vm626_vm0, %v2078_v13, 0.0 }
0x11be   : > { %2080 = vadd.xlane.f32.xlu0 %v2079_v15 }
0x124b   : > { %v2081_v14 = vpop.xlane.xlu0 %2080 }
0x124c   : > { %v2082_v19 = vmul.f32 0.03125, %v2081_v14 }
0x124e   : > { %v2083_v20 = vadd.f32 1e-05, %v2082_v19 }
0x1250   : > { %2953 = vrsqrt.f32 %v2083_v20 }
0x125a   : > { %v2954_v21 = vpop.eup %2953 }
0x125b   : > { %v2085_v18 = vmul.f32 %v2954_v21, %v2077_v12 }
0x125d   : > { %v2092_v22 = vmul.f32 %v2554_v23, %v2085_v18 }
0x125f   : > { %v2099_v26 = vadd.f32 %v2555_v24, %v2092_v22 }
0x1261   : > { %v2100_v27 = vpack.c.bf16 %v2099_v26, %v2099_v26 }
0x1263   : > { %2808 = vmatmul.mubr.msk.bf16.vlgmr.msra.gmra.mrb[40].mxu1 %vm626_vm0, %v2100_v27 }
0x1264   : > { %2827 = vmatprep.mubr.msk.bf16.mxu1 %vm3058_vm1, %v3057_v8  ;;  %2824 = vmatpush3.bf16.msra.mxu1 %v2911_v61 }
0x1265   : > { %2825 = vmatprep.subr.bf16.mxu1 %v3057_v8  ;;  %v2583_v8 = vld [vmem:[%s3687_s15 + $0x1] ss:$0 sm:$0xff] }
0x1268   : > { %2826 = vmatpush3.bf16.msra.mxu1 %v2912_v62 }
0x1336   : > { %v2163_v32 = vpop.f32.mrb[40].mxu1 }
0x1337   : > { %v2164_v33 = vadd.f32 %v2561_v31, %v2163_v32  ;;  %v2809_v34 = vpop.f32.mrb[41].mxu1 }
0x1338   : > { %v2166_v35 = vpop.f32.mrb[42].mxu1 }
0x1339   : > { %v2170_v36 = vmul.f32 0.044715, %v2164_v33  ;;  %v2810_v37 = vpop.f32.mrb[43].mxu1  ;;  %v2169_v44 = vmul.f32 0.5, %v2164_v33 }
0x133b   : > { %v2171_v39 = vmul.f32 %v2170_v36, %v2164_v33 }
0x133d   : > { %v2172_v40 = vmul.f32 %v2171_v39, %v2164_v33 }
0x133f   : > { %v2173_v41 = vadd.f32 %v2172_v40, %v2164_v33 }
0x1341   : > { %v2174_v42 = vmul.f32 0.7978846, %v2173_v41 }
0x1343   : > { %2955 = vtanh.f32 %v2174_v42 }
0x134d   : > { %v2956_v43 = vpop.eup %2955 }
0x134e   : > { %v2176_v45 = vadd.f32 1.0, %v2956_v43 }
0x1350   : > { %v2177_v46 = vmul.f32 %v2176_v45, %v2169_v44 }
0x1352   : > { %v2178_v47 = vpack.c.bf16 %v2177_v46, %v2177_v46 }
0x1354   : > { %2820 = vmatmul.mubr.msk.bf16.vlgmr.msra.gmra.mrb[48].mxu0 %vm1401_vm6, %v2178_v47 }
0x1427   : > { %v2257_v49 = vpop.f32.mrb[48].mxu0 }
0x1428   : > { %v2258_v50 = vadd.f32 %v2574_v48, %v2257_v49  ;;  %v2821_v51 = vpop.f32.mrb[49].mxu0 }
0x1429   : > { %v2260_v52 = vpop.f32.mrb[50].mxu0 }
0x142a   : > { %v2822_v53 = vpop.f32.mrb[51].mxu0  ;;  %v2263_v54 = vadd.f32 %v2258_v50, %v2099_v26 }
0x142c   : > { %v2268_v55 = vsel %vm626_vm0, %v2263_v54, 0.0 }
0x142d   : > { %2269 = vadd.xlane.f32.xlu0 %v2268_v55 }
0x14ba   : > { %v2270_v56 = vpop.xlane.xlu0 %2269 }
0x14bb   : > { %v2271_v57 = vmul.f32 0.03125, %v2270_v56 }
0x14bd   : > { %v2272_v58 = vsub.f32 %v2263_v54, %v2271_v57 }
0x14bf   : > { %v2273_v59 = vmul.f32 %v2272_v58, %v2272_v58 }
0x14c1   : > { %v2274_v60 = vsel %vm626_vm0, %v2273_v59, 0.0 }
0x14c2   : > { %2275 = vadd.xlane.f32.xlu1 %v2274_v60 }
0x154f   : > { %v2276_v63 = vpop.xlane.xlu1 %2275 }
0x1550   : > { %v2277_v0 = vmul.f32 0.03125, %v2276_v63 }
0x1552   : > { %v2278_v1 = vadd.f32 1e-05, %v2277_v0 }
0x1554   : > { %2957 = vrsqrt.f32 %v2278_v1 }
0x155e   : > { %v2958_v2 = vpop.eup %2957 }
0x155f   : > { %v2280_v38 = vmul.f32 %v2958_v2, %v2272_v58 }
0x1561   : > { %v2287_v4 = vmul.f32 %v2582_v3, %v2280_v38 }
0x1563   : > { %v2294_v5 = vadd.f32 %v2583_v8, %v2287_v4 }
0x1565   : > { %v2297_v6 = vpack.c.bf16 %v2294_v5, %v2294_v5  ;;  %v2295_v7 = vsel %vm626_vm0, %v2294_v5, 0.0 }
0x1566   : > { %2296 = vst [vmem:[%s608_s20] sm:$0xff] %v2295_v7 }
0x1567   : > { %2828 = vmatmul.mubr.msk.bf16.vlgmr.msra.gmra.mrb[44].mxu1 %vm626_vm0, %v2297_v6 }
0x1568   : > { %2974 = shalt.err (!%p2971_p3)
}
0x1569   : > { %s2975_s20 = scalar_lea.hbm %s3601_s28, 128  ;;  %s2979_s5 = scalar_lea.hbm %s3690_s18, 256 }
0x156a   : > { %p2976_p4 = scmp.ne.s32.totalorder %s3601_s28, %s2975_s20  ;;  %p2980_p9 = scmp.lt.u32.totalorder %s3601_s28, %s3690_s18 }
0x156b   : > { %p2981_p10 = scmp.lt.u32.totalorder %s2979_s5, %s2975_s20  ;;  %p2983_p12 = scmp.lt.u32.totalorder %s2975_s20, %s3601_s28 }
0x156c   : > { %p2977_p7 = pnand %p2976_p4, %p3213_p5 }
0x156d   : > { %p2982_p11 = por %p2981_p10, %p2980_p9 }
0x156e   : > { %p2978_p8 = pneg %p2977_p7 }
0x156f   : > { %p2984_p13 = por %p2983_p12, %p2982_p11 }
0x1571   : > { %p2985_p0 = pnand %p2984_p13, %p2978_p8 }
0x1573   : > { %2988 = shalt.err (!%p2985_p0)
}
0x1574   : > { %2831 = dma.vmem_to_hbm [thread:$0]  (%p3213_p5), %s2379_s4, 128, %s3601_s28, %s2361_s27   ;;  %v2302_v9 = vld [vmem:[%s3689_s17] sm:$0x1] }
0x1575   : > { %s2589_s20 = sshll.u32 %s3196_s1, 4  ;;  %s614_s25 = scalar_lea.vmem [#allocation4], %s3586_s2 }
0x1576   : > { %s2391_s22 = sshll.u32 %s614_s25, 4  ;;  %s3629_s6 = scalar_lea.hbm %s3691_s19, %s2589_s20  ;;  %s3631_s22 = int_to_ptr.vmem [resolvable:$true] %s2391_s22 }
0x1577   : > { %s2366_s4 = scalar_lea.sflag [#allocation5], %s3586_s2  ;;  %s2989_s28 = scalar_lea.vmem %s3631_s22, 16 }
0x1578   : > { %p2990_p1 = scmp.ne.s32.totalorder %s3631_s22, %s2989_s28  ;;  %s3074_s1 = smov [#allocation4]  }
0x1579   : > { %s2993_s27 = sshll.u32 %s3074_s1, 4  ;;  %s2994_s27 = int_to_ptr.vmem [resolvable:$false] %s2993_s27 }
0x157a   : > { %p2991_p2 = pnand %p2990_p1, %p3213_p5  ;;  %s2995_s24 = scalar_lea.vmem %s2994_s27, 32 }
0x157b   : > { %p2996_p4 = scmp.lt.s32.totalorder %s3631_s22, %s2994_s27  ;;  %p2997_p7 = scmp.lt.s32.totalorder %s2995_s24, %s2989_s28 }
0x157c   : > { %p2992_p3 = pneg %p2991_p2 }
0x157d   : > { %p2998_p8 = por %p2997_p7, %p2996_p4 }
0x157f   : > { %p2999_p9 = pnand %p2998_p8, %p2992_p3 }
0x163a   : > { %v2352_v10 = vpop.f32.mrb[44].mxu1 }
0x163b   : > { %v2353_v11 = vadd.f32 %v2352_v10, %v2302_v9  ;;  %v2829_v12 = vpop.f32.mrb[45].mxu1 }
0x163c   : > { %v2355_v13 = vpop.f32.mrb[46].mxu1 }
0x163d   : > { %2959 = vtanh.f32 %v2353_v11  ;;  %v2830_v15 = vpop.f32.mrb[47].mxu1 }
0x1647   : > { %v2960_v16 = vpop.eup %2959 }
0x1648   : > { %2359 = vst [vmem:[%s614_s25] sm:$0x1] %v2960_v16 }
0x1649   : > { %3002 = shalt.err (!%p2999_p9)
}
0x164a   : > { %s3003_s2 = scalar_lea.hbm %s3629_s6, 16  ;;  %s3007_s25 = scalar_lea.hbm %s3691_s19, 32 }
0x164b   : > { %p3004_p10 = scmp.ne.s32.totalorder %s3629_s6, %s3003_s2  ;;  %p3008_p13 = scmp.lt.u32.totalorder %s3629_s6, %s3691_s19 }
0x164c   : > { %p3009_p0 = scmp.lt.u32.totalorder %s3007_s25, %s3003_s2  ;;  %p3011_p2 = scmp.lt.u32.totalorder %s3003_s2, %s3629_s6 }
0x164d   : > { %p3005_p11 = pnand %p3004_p10, %p3213_p5 }
0x164e   : > { %p3010_p1 = por %p3009_p0, %p3008_p13 }
0x164f   : > { %p3006_p12 = pneg %p3005_p11 }
0x1650   : > { %p3012_p3 = por %p3011_p2, %p3010_p1 }
0x1652   : > { %p3013_p4 = pnand %p3012_p3, %p3006_p12 }
0x1654   : > { %3016 = shalt.err (!%p3013_p4)
}
0x1655   : > { %2832 = dma.vmem_to_hbm [thread:$0]  (%p3213_p5), %s3631_s22, 16, %s3629_s6, %s2366_s4  }
0x1656 PF: > { %p2842_p7 = scmp.ge.s32.totalorder %s3055_s21, 2  ;;  %s2403_s28 = sand.u32 1, %s3043_s0  }
0x1657   : > { %s2404_s1 = scalar_lea.sflag [#allocation3], %s2403_s28 }
0x1658   : > { %p2836_p8 = pnand %p2842_p7, %p3217_p6 }
0x165a   : > { %3034 = dma.done.wait (!%p2836_p8), %s2404_s1, 128  }
0x165b   : > { %3036 = vsyncadd (!%p2836_p8), %s2404_s1, 4294967168  ;;  %s2413_s27 = scalar_lea.sflag [#allocation5], %s2403_s28 }
0x165c   : > { %3038 = dma.done.wait (!%p2836_p8), %s2413_s27, 16  }
0x165d   : > { %3040 = vsyncadd (!%p2836_p8), %s2413_s27, 4294967280  ;;  %s3740_s21 = sld [smem:[#allocation9_spill]]  ;;  %s3741_s3 = sld [smem:[#allocation8_spill]] }
0x165e   : > { %s3742_s20 = sld [smem:[#allocation10_spill]]  ;;  %s3743_s0 = smov %s3047_s30 }
0x1663   : > { %p33_p5 = scmp.ge.s32.totalorder %s3740_s21, 4   ;;  %s3744_s30 = smov %s3741_s3 }
0x1665   :  { %35 = sbr.rel (!%p33_p5) target bundleno = 13 (0xd), region = 159 }
0x166c   :  { %2417 = vsyncpa [#allocation3], 1 }
0x166d   :  { %2419 = vsyncpa [#allocation3 + $0x1], 1 }
0x166e   :  { %2420 = vsyncpa [#allocation5], 1 }
0x166f   :  { %2422 = vsyncpa [#allocation5 + $0x1], 1 }

</bundles_post_ra>
